<compile_context>
chip_gen: v6e
topology: v6e:2x2x1
jax: 0.10.0
libtpu: 0.0.40
codegen_flags: <defaults>
</compile_context>

<pallas_src>
import jax
import jax.numpy as jnp
from jax.experimental import pallas as pl
from jax.experimental.pallas import tpu as pltpu


# Logical (PyTorch) dims and lane-padded dims.
D_IN, D_H, D_Z = 784, 400, 20
D_IN_P, D_H_P, D_Z_P = 896, 512, 128          # 7*128, 4*128, 1*128
TM_MAX = 256                                   # batch tile (multiple of 8)


def _vae_kernel(x_ref, eps_ref,
                w1_ref, b1_ref,
                wh_ref, bh_ref,
                w3_ref, b3_ref,
                w4_ref, b4_ref,
                recon_ref, head_ref):
    # encode: h = relu(x @ W1 + b1)                       (TM, 512) f32
    h = jnp.dot(x_ref[...].astype(jnp.bfloat16), w1_ref[...],
                preferred_element_type=jnp.float32) + b1_ref[...]
    h = jnp.maximum(h, 0.0)

    # fused latent head: [mu_pad | logvar_pad]            (TM, 256) f32
    head = jnp.dot(h.astype(jnp.bfloat16), wh_ref[...],
                   preferred_element_type=jnp.float32) + bh_ref[...]
    mu = head[:, :D_Z_P]            # 128-lane aligned slice (free)
    logvar = head[:, D_Z_P:]

    # reparameterize (training mode): z = eps * exp(0.5*logvar) + mu
    z = eps_ref[...] * jnp.exp(0.5 * logvar) + mu         # (TM, 128) f32

    # decode: h3 = relu(z @ W3 + b3); recon = sigmoid(h3 @ W4 + b4)
    h3 = jnp.dot(z.astype(jnp.bfloat16), w3_ref[...],
                 preferred_element_type=jnp.float32) + b3_ref[...]
    h3 = jnp.maximum(h3, 0.0)                             # (TM, 512)
    logits = jnp.dot(h3.astype(jnp.bfloat16), w4_ref[...],
                     preferred_element_type=jnp.float32) + b4_ref[...]
    # sigmoid: exp -> EUP, divide replaced by EUP approx reciprocal
    recon_ref[...] = pl.reciprocal(1.0 + jnp.exp(-logits), approx=True)
    head_ref[...] = head


def prepare_params(params):
    """Pad raw (in,out) f32 Linear params to lane-aligned shapes, fuse the
    mu/logvar heads, and cast weights to bf16 (biases stay f32)."""
    w1, b1, w21, b21, w22, b22, w3, b3, w4, b4 = params

    w1p = jnp.zeros((D_IN_P, D_H_P), jnp.float32).at[:D_IN, :D_H].set(w1)
    b1p = jnp.zeros((1, D_H_P), jnp.float32).at[:, :D_H].set(b1)

    whp = jnp.zeros((D_H_P, 2 * D_Z_P), jnp.float32)
    whp = whp.at[:D_H, :D_Z].set(w21).at[:D_H, D_Z_P:D_Z_P + D_Z].set(w22)
    bhp = jnp.zeros((1, 2 * D_Z_P), jnp.float32)
    bhp = bhp.at[:, :D_Z].set(b21).at[:, D_Z_P:D_Z_P + D_Z].set(b22)

    w3p = jnp.zeros((D_Z_P, D_H_P), jnp.float32).at[:D_Z, :D_H].set(w3)
    b3p = jnp.zeros((1, D_H_P), jnp.float32).at[:, :D_H].set(b3)

    w4p = jnp.zeros((D_H_P, D_IN_P), jnp.float32).at[:D_H, :D_IN].set(w4)
    b4p = jnp.zeros((1, D_IN_P), jnp.float32).at[:, :D_IN].set(b4)

    bf16 = jnp.bfloat16
    return (w1p.astype(bf16), b1p, whp.astype(bf16), bhp,
            w3p.astype(bf16), b3p, w4p.astype(bf16), b4p)


def vae_forward(x_img, eps, padded_params):
    """x_img: (B,1,28,28) f32; eps: (B,20) f32 ~ N(0,1)."""
    x = x_img.reshape(-1, D_IN).astype(jnp.float32)       # x.view(-1, 784)
    B = x.shape[0]

    # Batch tile: multiple of 8, capped at TM_MAX (real workloads want B >= 256).
    if B <= TM_MAX:
        tm = max(8, ((B + 7) // 8) * 8)
    else:
        tm = TM_MAX
    bp = ((B + tm - 1) // tm) * tm                        # padded batch

    # Zero-pad batch and feature dims (pad rows/cols contribute zeros).
    x_p = jnp.zeros((bp, D_IN_P), jnp.float32).at[:B, :D_IN].set(x)
    eps_p = jnp.zeros((bp, D_Z_P), jnp.float32).at[:B, :D_Z].set(eps)

    w1p, b1p, whp, bhp, w3p, b3p, w4p, b4p = padded_params

    def batch_spec(d):
        return pl.BlockSpec((tm, d), lambda i: (i, 0))

    def const_spec(arr):
        return pl.BlockSpec(arr.shape, lambda i: (0, 0))   # resident across steps

    recon_p, head_p = pl.pallas_call(
        _vae_kernel,
        grid=(bp // tm,),
        out_shape=(
            jax.ShapeDtypeStruct((bp, D_IN_P), jnp.float32),
            jax.ShapeDtypeStruct((bp, 2 * D_Z_P), jnp.float32),
        ),
        in_specs=[
            batch_spec(D_IN_P), batch_spec(D_Z_P),
            const_spec(w1p), const_spec(b1p),
            const_spec(whp), const_spec(bhp),
            const_spec(w3p), const_spec(b3p),
            const_spec(w4p), const_spec(b4p),
        ],
        out_specs=(batch_spec(D_IN_P), batch_spec(2 * D_Z_P)),
        compiler_params=pltpu.CompilerParams(
            dimension_semantics=("parallel",),
            vmem_limit_bytes=32 << 20,                    # ~11 MiB working set @ TM=256
        ),
    )(x_p, eps_p, w1p, b1p, whp, bhp, w3p, b3p, w4p, b4p)

    recon = recon_p[:B, :D_IN]
    mu = head_p[:B, :D_Z]
    logvar = head_p[:B, D_Z_P:D_Z_P + D_Z]
    return recon, mu, logvar


def init_params(key):
    """Deterministic synthetic parameters with PyTorch-Linear-like init.
    Weights stored as (in, out); biases as (1, out)."""
    ks = jax.random.split(key, 10)

    def lin(kw, kb, d_in, d_out):
        bound = 1.0 / jnp.sqrt(d_in)
        w = jax.random.uniform(kw, (d_in, d_out), jnp.float32, -bound, bound)
        b = jax.random.uniform(kb, (1, d_out), jnp.float32, -bound, bound)
        return w, b

    w1, b1 = lin(ks[0], ks[1], D_IN, D_H)     # fc1: 784 -> 400
    w21, b21 = lin(ks[2], ks[3], D_H, D_Z)    # fc2_1: 400 -> 20
    w22, b22 = lin(ks[4], ks[5], D_H, D_Z)    # fc2_2: 400 -> 20
    w3, b3 = lin(ks[6], ks[7], D_Z, D_H)      # fc3: 20 -> 400
    w4, b4 = lin(ks[8], ks[9], D_H, D_IN)     # fc4: 400 -> 784
    return (w1, b1, w21, b21, w22, b22, w3, b3, w4, b4)


def _reference(x_img, eps, params):
    """Plain-JAX f32 reference for correctness check."""
    w1, b1, w21, b21, w22, b22, w3, b3, w4, b4 = params
    x = x_img.reshape(-1, D_IN)
    h = jnp.maximum(x @ w1 + b1, 0.0)
    mu = h @ w21 + b21
    logvar = h @ w22 + b22
    z = eps * jnp.exp(0.5 * logvar) + mu
    h3 = jnp.maximum(z @ w3 + b3, 0.0)
    recon = jax.nn.sigmoid(h3 @ w4 + b4)
    return recon, mu, logvar


if __name__ == "__main__":
    key = jax.random.PRNGKey(0)
    k_params, k_x, k_eps = jax.random.split(key, 3)

    B = 2
    params = init_params(k_params)
    padded = prepare_params(params)
    x_img = jax.random.uniform(k_x, (B, 1, 28, 28), jnp.float32)   # MNIST-like input
    eps = jax.random.normal(k_eps, (B, D_Z), jnp.float32)          # torch.randn_like(std)

    recon, mu, logvar = vae_forward(x_img, eps, padded)
    jax.block_until_ready((recon, mu, logvar))

    r_ref, mu_ref, lv_ref = _reference(x_img, eps, params)
    assert recon.shape == (B, D_IN) and mu.shape == (B, D_Z) and logvar.shape == (B, D_Z)
    # bf16 matmuls + approx reciprocal -> loosened tolerance vs f32 reference.
    assert jnp.allclose(recon, r_ref, atol=5e-2, rtol=5e-2)
    assert jnp.allclose(mu, mu_ref, atol=5e-2, rtol=5e-2)
    assert jnp.allclose(logvar, lv_ref, atol=5e-2, rtol=5e-2)

    print("KERNEL_OK")
</pallas_src>

<mosaic_0001>
module attributes {stable_mosaic.version = 11 : i64} {
  func.func @_vae_kernel(%arg0: i32, %arg1: memref<8x896xf32, #tpu.memory_space<vmem>>, %arg2: memref<8x128xf32, #tpu.memory_space<vmem>>, %arg3: memref<896x512xbf16, #tpu.memory_space<vmem>>, %arg4: memref<1x512xf32, #tpu.memory_space<vmem>>, %arg5: memref<512x256xbf16, #tpu.memory_space<vmem>>, %arg6: memref<1x256xf32, #tpu.memory_space<vmem>>, %arg7: memref<128x512xbf16, #tpu.memory_space<vmem>>, %arg8: memref<1x512xf32, #tpu.memory_space<vmem>>, %arg9: memref<512x896xbf16, #tpu.memory_space<vmem>>, %arg10: memref<1x896xf32, #tpu.memory_space<vmem>>, %arg11: memref<8x896xf32, #tpu.memory_space<vmem>>, %arg12: memref<8x256xf32, #tpu.memory_space<vmem>>) attributes {dimension_semantics = [#tpu.dimension_semantics<parallel>], iteration_bounds = array<i64: 1>, scalar_prefetch = 0 : i64, scratch_operands = 0 : i64, tpu.core_type = #tpu.core_type<tc>, window_params = [{transform_indices = @transform_0, window_bounds = array<i64: 8, 896>}, {transform_indices = @transform_1, window_bounds = array<i64: 8, 128>}, {pipeline_mode = #tpu.pipeline_mode<synchronous>, transform_indices = @transform_2, window_bounds = array<i64: 896, 512>}, {pipeline_mode = #tpu.pipeline_mode<synchronous>, transform_indices = @transform_3, window_bounds = array<i64: 1, 512>}, {pipeline_mode = #tpu.pipeline_mode<synchronous>, transform_indices = @transform_4, window_bounds = array<i64: 512, 256>}, {pipeline_mode = #tpu.pipeline_mode<synchronous>, transform_indices = @transform_5, window_bounds = array<i64: 1, 256>}, {pipeline_mode = #tpu.pipeline_mode<synchronous>, transform_indices = @transform_6, window_bounds = array<i64: 128, 512>}, {pipeline_mode = #tpu.pipeline_mode<synchronous>, transform_indices = @transform_7, window_bounds = array<i64: 1, 512>}, {pipeline_mode = #tpu.pipeline_mode<synchronous>, transform_indices = @transform_8, window_bounds = array<i64: 512, 896>}, {pipeline_mode = #tpu.pipeline_mode<synchronous>, transform_indices = @transform_9, window_bounds = array<i64: 1, 896>}, {transform_indices = @transform_10, window_bounds = array<i64: 8, 896>}, {transform_indices = @transform_11, window_bounds = array<i64: 8, 256>}]} {
    %c0 = arith.constant 0 : index
    %c0_0 = arith.constant 0 : index
    %0 = vector.load %arg1[%c0, %c0_0] : memref<8x896xf32, #tpu.memory_space<vmem>>, vector<8x896xf32>
    %1 = arith.truncf %0 : vector<8x896xf32> to vector<8x896xbf16>
    %c0_1 = arith.constant 0 : index
    %c0_2 = arith.constant 0 : index
    %2 = vector.load %arg3[%c0_1, %c0_2] : memref<896x512xbf16, #tpu.memory_space<vmem>>, vector<896x512xbf16>
    %cst = arith.constant dense<0.000000e+00> : vector<8x512xf32>
    %3 = tpu.matmul %1, %2, %cst {dimension_numbers = #tpu.dot_dimension_numbers<[1], [0], [0], [1], [0, 0, 1, 1], [], []>} : vector<8x896xbf16>, vector<896x512xbf16>, vector<8x512xf32> -> vector<8x512xf32>
    %c0_3 = arith.constant 0 : index
    %c0_4 = arith.constant 0 : index
    %4 = vector.load %arg4[%c0_3, %c0_4] : memref<1x512xf32, #tpu.memory_space<vmem>>, vector<1x512xf32>
    %5 = vector.broadcast %4 : vector<1x512xf32> to vector<8x512xf32>
    %6 = arith.addf %3, %5 : vector<8x512xf32>
    %cst_5 = arith.constant 0.000000e+00 : f32
    %7 = vector.broadcast %cst_5 : f32 to vector<8x512xf32>
    %8 = arith.maximumf %6, %7 : vector<8x512xf32>
    %9 = arith.truncf %8 : vector<8x512xf32> to vector<8x512xbf16>
    %c0_6 = arith.constant 0 : index
    %c0_7 = arith.constant 0 : index
    %10 = vector.load %arg5[%c0_6, %c0_7] : memref<512x256xbf16, #tpu.memory_space<vmem>>, vector<512x256xbf16>
    %cst_8 = arith.constant dense<0.000000e+00> : vector<8x256xf32>
    %11 = tpu.matmul %9, %10, %cst_8 {dimension_numbers = #tpu.dot_dimension_numbers<[1], [0], [0], [1], [0, 0, 1, 1], [], []>} : vector<8x512xbf16>, vector<512x256xbf16>, vector<8x256xf32> -> vector<8x256xf32>
    %c0_9 = arith.constant 0 : index
    %c0_10 = arith.constant 0 : index
    %12 = vector.load %arg6[%c0_9, %c0_10] : memref<1x256xf32, #tpu.memory_space<vmem>>, vector<1x256xf32>
    %13 = vector.broadcast %12 : vector<1x256xf32> to vector<8x256xf32>
    %14 = arith.addf %11, %13 : vector<8x256xf32>
    %15 = vector.extract_strided_slice %14 {offsets = [0, 0], sizes = [8, 128], strides = [1, 1]} : vector<8x256xf32> to vector<8x128xf32>
    %16 = vector.extract_strided_slice %14 {offsets = [0, 128], sizes = [8, 128], strides = [1, 1]} : vector<8x256xf32> to vector<8x128xf32>
    %c0_11 = arith.constant 0 : index
    %c0_12 = arith.constant 0 : index
    %17 = vector.load %arg2[%c0_11, %c0_12] : memref<8x128xf32, #tpu.memory_space<vmem>>, vector<8x128xf32>
    %cst_13 = arith.constant 5.000000e-01 : f32
    %18 = vector.broadcast %cst_13 : f32 to vector<8x128xf32>
    %19 = arith.mulf %18, %16 : vector<8x128xf32>
    %20 = math.exp %19 : vector<8x128xf32>
    %21 = arith.mulf %17, %20 : vector<8x128xf32>
    %22 = arith.addf %21, %15 : vector<8x128xf32>
    %23 = arith.truncf %22 : vector<8x128xf32> to vector<8x128xbf16>
    %c0_14 = arith.constant 0 : index
    %c0_15 = arith.constant 0 : index
    %24 = vector.load %arg7[%c0_14, %c0_15] : memref<128x512xbf16, #tpu.memory_space<vmem>>, vector<128x512xbf16>
    %cst_16 = arith.constant dense<0.000000e+00> : vector<8x512xf32>
    %25 = tpu.matmul %23, %24, %cst_16 {dimension_numbers = #tpu.dot_dimension_numbers<[1], [0], [0], [1], [0, 0, 1, 1], [], []>} : vector<8x128xbf16>, vector<128x512xbf16>, vector<8x512xf32> -> vector<8x512xf32>
    %c0_17 = arith.constant 0 : index
    %c0_18 = arith.constant 0 : index
    %26 = vector.load %arg8[%c0_17, %c0_18] : memref<1x512xf32, #tpu.memory_space<vmem>>, vector<1x512xf32>
    %27 = vector.broadcast %26 : vector<1x512xf32> to vector<8x512xf32>
    %28 = arith.addf %25, %27 : vector<8x512xf32>
    %cst_19 = arith.constant 0.000000e+00 : f32
    %29 = vector.broadcast %cst_19 : f32 to vector<8x512xf32>
    %30 = arith.maximumf %28, %29 : vector<8x512xf32>
    %31 = arith.truncf %30 : vector<8x512xf32> to vector<8x512xbf16>
    %c0_20 = arith.constant 0 : index
    %c0_21 = arith.constant 0 : index
    %32 = vector.load %arg9[%c0_20, %c0_21] : memref<512x896xbf16, #tpu.memory_space<vmem>>, vector<512x896xbf16>
    %cst_22 = arith.constant dense<0.000000e+00> : vector<8x896xf32>
    %33 = tpu.matmul %31, %32, %cst_22 {dimension_numbers = #tpu.dot_dimension_numbers<[1], [0], [0], [1], [0, 0, 1, 1], [], []>} : vector<8x512xbf16>, vector<512x896xbf16>, vector<8x896xf32> -> vector<8x896xf32>
    %c0_23 = arith.constant 0 : index
    %c0_24 = arith.constant 0 : index
    %34 = vector.load %arg10[%c0_23, %c0_24] : memref<1x896xf32, #tpu.memory_space<vmem>>, vector<1x896xf32>
    %35 = vector.broadcast %34 : vector<1x896xf32> to vector<8x896xf32>
    %36 = arith.addf %33, %35 : vector<8x896xf32>
    %cst_25 = arith.constant 0.000000e+00 : f32
    %37 = vector.broadcast %cst_25 : f32 to vector<8x896xf32>
    %38 = arith.subf %37, %36 : vector<8x896xf32>
    %39 = math.exp %38 : vector<8x896xf32>
    %cst_26 = arith.constant 1.000000e+00 : f32
    %40 = vector.broadcast %cst_26 : f32 to vector<8x896xf32>
    %41 = arith.addf %40, %39 : vector<8x896xf32>
    %42 = tpu.reciprocal %41 {approx = true} : vector<8x896xf32> -> vector<8x896xf32>
    %c0_27 = arith.constant 0 : index
    %c0_28 = arith.constant 0 : index
    %43 = vector.load %arg11[%c0_27, %c0_28] : memref<8x896xf32, #tpu.memory_space<vmem>>, vector<8x896xf32>
    tpu.vector_store %arg11[%c0_27, %c0_28], %42 {strides = array<i32>} : memref<8x896xf32, #tpu.memory_space<vmem>>, vector<8x896xf32>,
    %c0_29 = arith.constant 0 : index
    %c0_30 = arith.constant 0 : index
    %44 = vector.load %arg12[%c0_29, %c0_30] : memref<8x256xf32, #tpu.memory_space<vmem>>, vector<8x256xf32>
    tpu.vector_store %arg12[%c0_29, %c0_30], %14 {strides = array<i32>} : memref<8x256xf32, #tpu.memory_space<vmem>>, vector<8x256xf32>,
    return
  }
  func.func @transform_0(%arg0: i32) -> (i32, i32) {
    %c0_i32 = arith.constant 0 : i32
    %c0_i32_0 = arith.constant 0 : i32
    return %arg0, %c0_i32 : i32, i32
  }
  func.func @transform_1(%arg0: i32) -> (i32, i32) {
    %c0_i32 = arith.constant 0 : i32
    %c0_i32_0 = arith.constant 0 : i32
    return %arg0, %c0_i32 : i32, i32
  }
  func.func @transform_2(%arg0: i32) -> (i32, i32) {
    %c0_i32 = arith.constant 0 : i32
    %c0_i32_0 = arith.constant 0 : i32
    %c0_i32_1 = arith.constant 0 : i32
    return %c0_i32, %c0_i32_0 : i32, i32
  }
  func.func @transform_3(%arg0: i32) -> (i32, i32) {
    %c0_i32 = arith.constant 0 : i32
    %c0_i32_0 = arith.constant 0 : i32
    %c0_i32_1 = arith.constant 0 : i32
    return %c0_i32, %c0_i32_0 : i32, i32
  }
  func.func @transform_4(%arg0: i32) -> (i32, i32) {
    %c0_i32 = arith.constant 0 : i32
    %c0_i32_0 = arith.constant 0 : i32
    %c0_i32_1 = arith.constant 0 : i32
    return %c0_i32, %c0_i32_0 : i32, i32
  }
  func.func @transform_5(%arg0: i32) -> (i32, i32) {
    %c0_i32 = arith.constant 0 : i32
    %c0_i32_0 = arith.constant 0 : i32
    %c0_i32_1 = arith.constant 0 : i32
    return %c0_i32, %c0_i32_0 : i32, i32
  }
  func.func @transform_6(%arg0: i32) -> (i32, i32) {
    %c0_i32 = arith.constant 0 : i32
    %c0_i32_0 = arith.constant 0 : i32
    %c0_i32_1 = arith.constant 0 : i32
    return %c0_i32, %c0_i32_0 : i32, i32
  }
  func.func @transform_7(%arg0: i32) -> (i32, i32) {
    %c0_i32 = arith.constant 0 : i32
    %c0_i32_0 = arith.constant 0 : i32
    %c0_i32_1 = arith.constant 0 : i32
    return %c0_i32, %c0_i32_0 : i32, i32
  }
  func.func @transform_8(%arg0: i32) -> (i32, i32) {
    %c0_i32 = arith.constant 0 : i32
    %c0_i32_0 = arith.constant 0 : i32
    %c0_i32_1 = arith.constant 0 : i32
    return %c0_i32, %c0_i32_0 : i32, i32
  }
  func.func @transform_9(%arg0: i32) -> (i32, i32) {
    %c0_i32 = arith.constant 0 : i32
    %c0_i32_0 = arith.constant 0 : i32
    %c0_i32_1 = arith.constant 0 : i32
    return %c0_i32, %c0_i32_0 : i32, i32
  }
  func.func @transform_10(%arg0: i32) -> (i32, i32) {
    %c0_i32 = arith.constant 0 : i32
    %c0_i32_0 = arith.constant 0 : i32
    return %arg0, %c0_i32 : i32, i32
  }
  func.func @transform_11(%arg0: i32) -> (i32, i32) {
    %c0_i32 = arith.constant 0 : i32
    %c0_i32_0 = arith.constant 0 : i32
    return %arg0, %c0_i32 : i32, i32
  }
}

</mosaic_0001>

<bundles_post_ra>
// kernel: tpu_custom_call.1
= control target key start
LH: loop header
LB: loop body
LE: loop exit
PB: predicated region body
PF: predicated region fallthrough
CT: control target
= control target key end

     0   :  { %17 = vsyncpa [#allocation3], 0  ;;  %s6327_s0 = inlined_call_operand.hbm [shape: f32[8,896], index: 0, kind: input, shape index: {}]   ;;  %s6328_s1 = inlined_call_operand.hbm [shape: f32[8,128], index: 1, kind: input, shape index: {}]   ;;  %s6329_s2 = inlined_call_operand.hbm [shape: bf16[896,512], index: 2, kind: input, shape index: {}]   ;;  %s6330_s3 = inlined_call_operand.vmem [shape: f32[1,512], index: 3, kind: input, shape index: {}]   ;;  %s6331_s4 = inlined_call_operand.hbm [shape: bf16[512,256], index: 4, kind: input, shape index: {}]   ;;  %s6332_s5 = inlined_call_operand.vmem [shape: f32[1,256], index: 5, kind: input, shape index: {}]   ;;  %s6333_s6 = inlined_call_operand.hbm [shape: bf16[128,512], index: 6, kind: input, shape index: {}]   ;;  %s6334_s7 = inlined_call_operand.hbm [shape: f32[1,512], index: 7, kind: input, shape index: {}]   ;;  %s6335_s8 = inlined_call_operand.hbm [shape: bf16[512,896], index: 8, kind: input, shape index: {}]   ;;  %s6336_s9 = inlined_call_operand.vmem [shape: f32[1,896], index: 9, kind: input, shape index: {}]   ;;  %s6337_s10 = inlined_call_operand.hbm [shape: f32[8,896], index: 10, kind: output, shape index: {0}]   ;;  %s6338_s11 = inlined_call_operand.hbm [shape: f32[8,256], index: 11, kind: output, shape index: {1}]  }
   0x1   :  { %18 = vsyncpa [#allocation6], 0 }
   0x2   :  { %19 = vsyncpa [#allocation9], 0 }
   0x3   :  { %20 = vsyncpa [#allocation12], 0 }
   0x4   :  { %21 = vsyncpa [#allocation4], 0 }
   0x5   :  { %22 = vsyncpa [#allocation16], 0  ;;  %s6107_s17 = smov [#allocation5]   ;;  %s6108_s19 = smov [#allocation8]  }
   0x6   :  { %s39_s18 = sshll.u32 %s6107_s17, 4  ;;  %s62_s20 = sshll.u32 %s6108_s19, 4  ;;  %s40_s18 = int_to_ptr.vmem [resolvable:$true] %s39_s18  ;;  %s63_s20 = int_to_ptr.vmem [resolvable:$true] %s62_s20 }
   0x7   :  { %s5923_s21 = scalar_lea.vmem %s40_s18, 128  ;;  %p5928_p1 = scmp.lt.s32.totalorder %s40_s18, %s40_s18 }
   0x8   :  { %p5924_p0 = scmp.ne.s32.totalorder %s40_s18, %s5923_s21  ;;  %p5929_p2 = scmp.lt.s32.totalorder %s5923_s21, %s5923_s21 }
   0xa   :  { %p5930_p3 = por %p5929_p2, %p5928_p1 }
   0xc   :  { %p5931_p4 = pnand %p5930_p3, %p5924_p0 }
   0xe   :  { %5934 = shalt.err (!%p5931_p4)
}
   0xf   :  { %42 = dma.hbm_to_vmem [thread:$0]  %s6328_s1, 128, %s40_s18, [#allocation6]  }
  0x10   :  { %s5943_s24 = scalar_lea.vmem %s63_s20, 8192  ;;  %p5948_p6 = scmp.lt.s32.totalorder %s63_s20, %s63_s20 }
  0x11   :  { %p5944_p5 = scmp.ne.s32.totalorder %s63_s20, %s5943_s24  ;;  %p5949_p7 = scmp.lt.s32.totalorder %s5943_s24, %s5943_s24 }
  0x13   :  { %p5950_p8 = por %p5949_p7, %p5948_p6 }
  0x15   :  { %p5951_p9 = pnand %p5950_p8, %p5944_p5 }
  0x17   :  { %5954 = shalt.err (!%p5951_p9)
}
  0x18   :  { %s6109_s25 = smov 128   ;;  %s6110_s26 = smov 8  }
  0x19   :  { %68 = dma.hbm_to_vmem [thread:$0]  %s6331_s4, 8192, %s63_s20, [#allocation9], %s6109_s25, %s6109_s25, %s6110_s26  }
  0x1a   :  { %s6111_s29 = smov [#allocation11]   ;;  %s6112_s12 = smov [#allocation2]  }
  0x1b   :  { %s89_s30 = sshll.u32 %s6111_s29, 4  ;;  %s29_s13 = sshll.u32 %s6112_s12, 4  ;;  %s90_s30 = int_to_ptr.vmem [resolvable:$true] %s89_s30  ;;  %s30_s13 = int_to_ptr.vmem [resolvable:$true] %s29_s13 }
  0x1c   :  { %s5963_s1 = scalar_lea.vmem %s90_s30, 64  ;;  %p5968_p11 = scmp.lt.s32.totalorder %s90_s30, %s90_s30 }
  0x1d   :  { %p5964_p10 = scmp.ne.s32.totalorder %s90_s30, %s5963_s1  ;;  %p5969_p12 = scmp.lt.s32.totalorder %s5963_s1, %s5963_s1 }
  0x1f   :  { %p5970_p13 = por %p5969_p12, %p5968_p11 }
  0x21   :  { %p5971_p0 = pnand %p5970_p13, %p5964_p10 }
  0x23   :  { %5974 = shalt.err (!%p5971_p0)
}
  0x24   :  { %92 = dma.hbm_to_vmem [thread:$0]  %s6334_s7, 64, %s90_s30, [#allocation12]  }
  0x25   :  { %s5983_s16 = scalar_lea.vmem %s30_s13, 896  ;;  %p5988_p2 = scmp.lt.s32.totalorder %s30_s13, %s30_s13 }
  0x26   :  { %p5984_p1 = scmp.ne.s32.totalorder %s30_s13, %s5983_s16  ;;  %p5989_p3 = scmp.lt.s32.totalorder %s5983_s16, %s5983_s16 }
  0x28   :  { %p5990_p4 = por %p5989_p3, %p5988_p2 }
  0x2a   :  { %p5991_p5 = pnand %p5990_p4, %p5984_p1 }
  0x2c   :  { %5994 = shalt.err (!%p5991_p5)
}
  0x2d   :  { %32 = dma.hbm_to_vmem [thread:$0]  %s6327_s0, 896, %s30_s13, [#allocation3]  }
  0x2e   :  { %s6113_s18 = smov [#allocation7]  }
  0x2f   :  { %s48_s19 = sshll.u32 %s6113_s18, 4  ;;  %s49_s19 = int_to_ptr.vmem [resolvable:$true] %s48_s19 }
  0x30   :  { %s6003_s20 = scalar_lea.vmem %s49_s19, 28672  ;;  %p6008_p7 = scmp.lt.s32.totalorder %s49_s19, %s49_s19 }
  0x31   :  { %p6004_p6 = scmp.ne.s32.totalorder %s49_s19, %s6003_s20  ;;  %p6009_p8 = scmp.lt.s32.totalorder %s6003_s20, %s6003_s20 }
  0x33   :  { %p6010_p9 = por %p6009_p8, %p6008_p7 }
  0x35   :  { %p6011_p10 = pnand %p6010_p9, %p6004_p6 }
  0x37   :  { %6014 = shalt.err (!%p6011_p10)
}
  0x38   :  { %s6114_s7 = smov 256   ;;  %s6115_s21 = smov 16  }
  0x39   :  { %54 = dma.hbm_to_vmem [thread:$0]  %s6329_s2, 28672, %s49_s19, [#allocation6], %s6114_s7, %s6114_s7, %s6115_s21  }
  0x3a   :  { %s6116_s24 = smov [#allocation10]   ;;  %s6117_s0 = smov [#allocation13]  }
  0x3b   :  { %s76_s25 = sshll.u32 %s6116_s24, 4  ;;  %s98_s26 = sshll.u32 %s6117_s0, 4  ;;  %s77_s25 = int_to_ptr.vmem [resolvable:$true] %s76_s25  ;;  %s99_s26 = int_to_ptr.vmem [resolvable:$true] %s98_s26 }
  0x3c   :  { %s6023_s27 = scalar_lea.vmem %s77_s25, 4096  ;;  %p6028_p12 = scmp.lt.s32.totalorder %s77_s25, %s77_s25 }
  0x3d   :  { %p6024_p11 = scmp.ne.s32.totalorder %s77_s25, %s6023_s27  ;;  %p6029_p13 = scmp.lt.s32.totalorder %s6023_s27, %s6023_s27 }
  0x3f   :  { %p6030_p0 = por %p6029_p13, %p6028_p12 }
  0x41   :  { %p6031_p1 = pnand %p6030_p0, %p6024_p11 }
  0x43   :  { %6034 = shalt.err (!%p6031_p1)
}
  0x44   :  { %82 = dma.hbm_to_vmem [thread:$0]  %s6333_s6, 4096, %s77_s25, [#allocation9], %s6114_s7, %s6114_s7, %s6115_s21  }
  0x45   :  { %s6043_s30 = scalar_lea.vmem %s99_s26, 28672  ;;  %p6048_p3 = scmp.lt.s32.totalorder %s99_s26, %s99_s26 }
  0x46   :  { %p6044_p2 = scmp.ne.s32.totalorder %s99_s26, %s6043_s30  ;;  %p6049_p4 = scmp.lt.s32.totalorder %s6043_s30, %s6043_s30 }
  0x48   :  { %p6050_p5 = por %p6049_p4, %p6048_p3 }
  0x4a   :  { %p6051_p6 = pnand %p6050_p5, %p6044_p2 }
  0x4c   :  { %6054 = shalt.err (!%p6051_p6)
}
  0x4d   :  { %s6118_s2 = smov 448   ;;  %s6119_s12 = smov 28  }
  0x4e   :  { %104 = dma.hbm_to_vmem [thread:$0]  %s6335_s8, 28672, %s99_s26, [#allocation12], %s6118_s2, %s6118_s2, %s6119_s12  }
  0x4f   :  { %6095 = dma.done.wait [#allocation3], 896  }
  0x50   :  { %6096 = vsyncadd [#allocation3], 4294966400 }
  0x51   :  { %6097 = dma.done.wait [#allocation6], 28800  }
  0x52   :  { %6098 = vsyncadd [#allocation6], 4294938496 }
  0x53   :  { %6099 = dma.done.wait [#allocation9], 12288  }
  0x54   :  { %6100 = vsyncadd [#allocation9], 4294955008 }
  0x55   :  { %6101 = dma.done.wait [#allocation12], 28736  }
  0x56   :  { %6102 = vsyncadd [#allocation12], 4294938560  ;;  %v5085_v0 = vld [vmem:[#allocation7 + $0xe4] ss:$16 sps:$4 sm:$0xff]   ;;  %v5089_v2 = vld [vmem:[#allocation7 + $0xe0] ss:$16 sps:$4 sm:$0xff]  }
  0x57   :  { %v5087_v1 = vld [vmem:[#allocation7 + $0x2e4] ss:$16 sps:$4 sm:$0xff]   ;;  %1509 = vmatprep.subr.bf16.mxu0 %v5085_v0  ;;  %v5090_v3 = vld [vmem:[#allocation7 + $0x2e0] ss:$16 sps:$4 sm:$0xff]   ;;  %v130_v46 = vld [vmem:[#allocation2 + $0x8] sm:$0xff] }
  0x58   :  { %1550 = vmatprep.subr.bf16.mxu1 %v5087_v1  ;;  %v5091_v4 = vld [vmem:[#allocation7 + $0xc4] ss:$16 sps:$4 sm:$0xff]   ;;  %1510 = vmatpush1.bf16.msra.mxu0 %v5089_v2  ;;  %v5095_v6 = vld [vmem:[#allocation7 + $0xc0] ss:$16 sps:$4 sm:$0xff]   ;;  %v6204_v49 = vpack.c.bf16 %v130_v46, %v130_v46  ;;  %v132_v50 = vld [vmem:[#allocation2 + $0x18] sm:$0xff] }
  0x59   :  { %1551 = vmatpush1.bf16.msra.mxu1 %v5090_v3  ;;  %v5093_v5 = vld [vmem:[#allocation7 + $0x2c4] ss:$16 sps:$4 sm:$0xff]   ;;  %1511 = vmatprep.subr.bf16.mxu0 %v5091_v4  ;;  %v5096_v7 = vld [vmem:[#allocation7 + $0x2c0] ss:$16 sps:$4 sm:$0xff]   ;;  %v6206_v52 = vpack.c.bf16 %v132_v50, %v132_v50 }
  0x5a   :  { %1552 = vmatprep.subr.bf16.mxu1 %v5093_v5  ;;  %v5097_v8 = vld [vmem:[#allocation7 + $0xa4] ss:$16 sps:$4 sm:$0xff]   ;;  %v5101_v10 = vld [vmem:[#allocation7 + $0xa0] ss:$16 sps:$4 sm:$0xff]   ;;  %1541 = vmatprep.mubr.bf16.mxu0 %v6204_v49 }
  0x5b   :  { %v5099_v9 = vld [vmem:[#allocation7 + $0x2a4] ss:$16 sps:$4 sm:$0xff]   ;;  %v5102_v11 = vld [vmem:[#allocation7 + $0x2a0] ss:$16 sps:$4 sm:$0xff]   ;;  %1582 = vmatprep.mubr.bf16.mxu1 %v6206_v52 }
  0x5c   :  { %1512 = vmatpush1.bf16.msra.mxu0 %v5095_v6  ;;  %v5103_v12 = vld [vmem:[#allocation7 + $0x84] ss:$16 sps:$4 sm:$0xff]   ;;  %v5107_v14 = vld [vmem:[#allocation7 + $0x80] ss:$16 sps:$4 sm:$0xff]  }
  0x5d   :  { %1553 = vmatpush1.bf16.msra.mxu1 %v5096_v7  ;;  %1513 = vmatprep.subr.bf16.mxu0 %v5097_v8  ;;  %v5105_v13 = vld [vmem:[#allocation7 + $0x284] ss:$16 sps:$4 sm:$0xff]   ;;  %v5108_v15 = vld [vmem:[#allocation7 + $0x280] ss:$16 sps:$4 sm:$0xff]  }
  0x5e   :  { %1554 = vmatprep.subr.bf16.mxu1 %v5099_v9  ;;  %v5109_v16 = vld [vmem:[#allocation7 + $0x64] ss:$16 sps:$4 sm:$0xff]   ;;  %v5113_v18 = vld [vmem:[#allocation7 + $0x60] ss:$16 sps:$4 sm:$0xff]  }
  0x5f   :  { %v5111_v17 = vld [vmem:[#allocation7 + $0x264] ss:$16 sps:$4 sm:$0xff]   ;;  %v5114_v19 = vld [vmem:[#allocation7 + $0x260] ss:$16 sps:$4 sm:$0xff]  }
  0x60   :  { %1514 = vmatpush1.bf16.msra.mxu0 %v5101_v10  ;;  %v5115_v20 = vld [vmem:[#allocation7 + $0x44] ss:$16 sps:$4 sm:$0xff]   ;;  %v5119_v22 = vld [vmem:[#allocation7 + $0x40] ss:$16 sps:$4 sm:$0xff]  }
  0x61   :  { %1555 = vmatpush1.bf16.msra.mxu1 %v5102_v11  ;;  %1515 = vmatprep.subr.bf16.mxu0 %v5103_v12  ;;  %v5117_v21 = vld [vmem:[#allocation7 + $0x244] ss:$16 sps:$4 sm:$0xff]   ;;  %v5120_v23 = vld [vmem:[#allocation7 + $0x240] ss:$16 sps:$4 sm:$0xff]  }
  0x62   :  { %1556 = vmatprep.subr.bf16.mxu1 %v5105_v13  ;;  %v5121_v24 = vld [vmem:[#allocation7 + $0x24] ss:$16 sps:$4 sm:$0xff]   ;;  %v5125_v26 = vld [vmem:[#allocation7 + $0x20] ss:$16 sps:$4 sm:$0xff]  }
  0x63   :  { %v5123_v25 = vld [vmem:[#allocation7 + $0x224] ss:$16 sps:$4 sm:$0xff]   ;;  %v5126_v27 = vld [vmem:[#allocation7 + $0x220] ss:$16 sps:$4 sm:$0xff]  }
  0x64   :  { %1516 = vmatpush1.bf16.msra.mxu0 %v5107_v14  ;;  %v5127_v28 = vld [vmem:[#allocation7 + $0x4] ss:$16 sps:$4 sm:$0xff]   ;;  %v5131_v30 = vld [vmem:[#allocation7] ss:$16 sps:$4 sm:$0xff]  }
  0x65   :  { %1557 = vmatpush1.bf16.msra.mxu1 %v5108_v15  ;;  %1517 = vmatprep.subr.bf16.mxu0 %v5109_v16  ;;  %v5129_v29 = vld [vmem:[#allocation7 + $0x204] ss:$16 sps:$4 sm:$0xff]   ;;  %v5132_v31 = vld [vmem:[#allocation7 + $0x200] ss:$16 sps:$4 sm:$0xff]  }
  0x66   :  { %1558 = vmatprep.subr.bf16.mxu1 %v5111_v17  ;;  %v5133_v32 = vld [vmem:[#allocation7 + $0x1e4] ss:$16 sps:$4 sm:$0xff]   ;;  %v5137_v34 = vld [vmem:[#allocation7 + $0x1e0] ss:$16 sps:$4 sm:$0xff]  }
  0x67   :  { %v5135_v33 = vld [vmem:[#allocation7 + $0x3e4] ss:$16 sps:$4 sm:$0xff]   ;;  %v5138_v35 = vld [vmem:[#allocation7 + $0x3e0] ss:$16 sps:$4 sm:$0xff]  }
  0x68   :  { %1518 = vmatpush1.bf16.msra.mxu0 %v5113_v18  ;;  %v5139_v36 = vld [vmem:[#allocation7 + $0x1c4] ss:$16 sps:$4 sm:$0xff]   ;;  %v5143_v38 = vld [vmem:[#allocation7 + $0x1c0] ss:$16 sps:$4 sm:$0xff]   ;;  %v6120_v18 = vmov 0  }
  0x69   :  { %1559 = vmatpush1.bf16.msra.mxu1 %v5114_v19  ;;  %1519 = vmatprep.subr.bf16.mxu0 %v5115_v20  ;;  %v5141_v37 = vld [vmem:[#allocation7 + $0x3c4] ss:$16 sps:$4 sm:$0xff]   ;;  %v5144_v39 = vld [vmem:[#allocation7 + $0x3c0] ss:$16 sps:$4 sm:$0xff]  }
  0x6a   :  { %1560 = vmatprep.subr.bf16.mxu1 %v5117_v21  ;;  %v5145_v40 = vld [vmem:[#allocation7 + $0x1a4] ss:$16 sps:$4 sm:$0xff]   ;;  %v5149_v42 = vld [vmem:[#allocation7 + $0x1a0] ss:$16 sps:$4 sm:$0xff]  }
  0x6b   :  { %v5147_v41 = vld [vmem:[#allocation7 + $0x3a4] ss:$16 sps:$4 sm:$0xff]   ;;  %v5150_v43 = vld [vmem:[#allocation7 + $0x3a0] ss:$16 sps:$4 sm:$0xff]  }
  0x6c   :  { %1520 = vmatpush1.bf16.msra.mxu0 %v5119_v22  ;;  %v5151_v44 = vld [vmem:[#allocation7 + $0x184] ss:$16 sps:$4 sm:$0xff]   ;;  %v5155_v47 = vld [vmem:[#allocation7 + $0x180] ss:$16 sps:$4 sm:$0xff]  }
  0x6d   :  { %1561 = vmatpush1.bf16.msra.mxu1 %v5120_v23  ;;  %1521 = vmatprep.subr.bf16.mxu0 %v5121_v24  ;;  %v5153_v45 = vld [vmem:[#allocation7 + $0x384] ss:$16 sps:$4 sm:$0xff]   ;;  %v5156_v48 = vld [vmem:[#allocation7 + $0x380] ss:$16 sps:$4 sm:$0xff]  }
  0x6e   :  { %1562 = vmatprep.subr.bf16.mxu1 %v5123_v25  ;;  %v5157_v51 = vld [vmem:[#allocation7 + $0x164] ss:$16 sps:$4 sm:$0xff]   ;;  %v5161_v54 = vld [vmem:[#allocation7 + $0x160] ss:$16 sps:$4 sm:$0xff]  }
  0x6f   :  { %v5159_v53 = vld [vmem:[#allocation7 + $0x364] ss:$16 sps:$4 sm:$0xff]   ;;  %v5162_v55 = vld [vmem:[#allocation7 + $0x360] ss:$16 sps:$4 sm:$0xff]  }
  0x70   :  { %1522 = vmatpush1.bf16.msra.mxu0 %v5125_v26  ;;  %v5163_v56 = vld [vmem:[#allocation7 + $0x144] ss:$16 sps:$4 sm:$0xff]   ;;  %v5167_v58 = vld [vmem:[#allocation7 + $0x140] ss:$16 sps:$4 sm:$0xff]  }
  0x71   :  { %1563 = vmatpush1.bf16.msra.mxu1 %v5126_v27  ;;  %1523 = vmatprep.subr.bf16.mxu0 %v5127_v28  ;;  %v5165_v57 = vld [vmem:[#allocation7 + $0x344] ss:$16 sps:$4 sm:$0xff]   ;;  %v5168_v59 = vld [vmem:[#allocation7 + $0x340] ss:$16 sps:$4 sm:$0xff]  }
  0x72   :  { %1564 = vmatprep.subr.bf16.mxu1 %v5129_v29  ;;  %v5169_v60 = vld [vmem:[#allocation7 + $0x124] ss:$16 sps:$4 sm:$0xff]   ;;  %v5173_v62 = vld [vmem:[#allocation7 + $0x120] ss:$16 sps:$4 sm:$0xff]  }
  0x73   :  { %v5171_v61 = vld [vmem:[#allocation7 + $0x324] ss:$16 sps:$4 sm:$0xff]   ;;  %v5174_v63 = vld [vmem:[#allocation7 + $0x320] ss:$16 sps:$4 sm:$0xff]  }
  0x74   :  { %1524 = vmatpush1.bf16.msra.mxu0 %v5131_v30  ;;  %v5175_v0 = vld [vmem:[#allocation7 + $0x104] ss:$16 sps:$4 sm:$0xff]   ;;  %v5179_v2 = vld [vmem:[#allocation7 + $0x100] ss:$16 sps:$4 sm:$0xff]  }
  0x75   :  { %1565 = vmatpush1.bf16.msra.mxu1 %v5132_v31  ;;  %1525 = vmatprep.subr.bf16.mxu0 %v5133_v32  ;;  %v5177_v1 = vld [vmem:[#allocation7 + $0x304] ss:$16 sps:$4 sm:$0xff]   ;;  %v5180_v3 = vld [vmem:[#allocation7 + $0x300] ss:$16 sps:$4 sm:$0xff]  }
  0x76   :  { %1566 = vmatprep.subr.bf16.mxu1 %v5135_v33  ;;  %v129_v4 = vld [vmem:[#allocation2] sm:$0xff]  ;;  %v131_v5 = vld [vmem:[#allocation2 + $0x10] sm:$0xff] }
  0x77   :  { %v5183_v6 = vld [vmem:[#allocation7 + $0x4e4] ss:$16 sps:$4 sm:$0xff]   ;;  %v6210_v8 = vpack.c.bf16 %v129_v4, %v129_v4  ;;  %v6212_v9 = vpack.c.bf16 %v131_v5, %v131_v5  ;;  %v5181_v10 = vld [vmem:[#allocation7 + $0x4e0] ss:$16 sps:$4 sm:$0xff]   ;;  %v5262_v5 = vld [vmem:[#allocation7 + $0x48] ss:$16 sps:$4 sm:$0xff]  }
  0x78   :  { %1526 = vmatpush2.bf16.msra.mxu0 %v5137_v34  ;;  %v5186_v7 = vld [vmem:[#allocation7 + $0x6e4] ss:$16 sps:$4 sm:$0xff]   ;;  %v5184_v11 = vld [vmem:[#allocation7 + $0x6e0] ss:$16 sps:$4 sm:$0xff]  }
  0x79   :  { %1567 = vmatpush2.bf16.msra.mxu1 %v5138_v35  ;;  %1527 = vmatprep.subr.bf16.mxu0 %v5139_v36  ;;  %v5189_v12 = vld [vmem:[#allocation7 + $0x4c4] ss:$16 sps:$4 sm:$0xff]   ;;  %v5187_v14 = vld [vmem:[#allocation7 + $0x4c0] ss:$16 sps:$4 sm:$0xff]   ;;  %v134_v36 = vld [vmem:[#allocation2 + $0x28] sm:$0xff] }
  0x7a   :  { %1568 = vmatprep.subr.bf16.mxu1 %v5141_v37  ;;  %v5192_v13 = vld [vmem:[#allocation7 + $0x6c4] ss:$16 sps:$4 sm:$0xff]   ;;  %v5190_v15 = vld [vmem:[#allocation7 + $0x6c0] ss:$16 sps:$4 sm:$0xff]  }
  0x7b   :  { %v5195_v16 = vld [vmem:[#allocation7 + $0x4a4] ss:$16 sps:$4 sm:$0xff]   ;;  %v5193_v19 = vld [vmem:[#allocation7 + $0x4a0] ss:$16 sps:$4 sm:$0xff]  }
  0x7c   :  { %1528 = vmatpush2.bf16.msra.mxu0 %v5143_v38  ;;  %v5198_v17 = vld [vmem:[#allocation7 + $0x6a4] ss:$16 sps:$4 sm:$0xff]   ;;  %v5196_v20 = vld [vmem:[#allocation7 + $0x6a0] ss:$16 sps:$4 sm:$0xff]  }
  0x7d   :  { %1569 = vmatpush2.bf16.msra.mxu1 %v5144_v39  ;;  %1529 = vmatprep.subr.bf16.mxu0 %v5145_v40  ;;  %v5201_v21 = vld [vmem:[#allocation7 + $0x484] ss:$16 sps:$4 sm:$0xff]   ;;  %v5199_v23 = vld [vmem:[#allocation7 + $0x480] ss:$16 sps:$4 sm:$0xff]   ;;  %v6217_v39 = vpack.c.bf16 %v134_v36, %v134_v36  ;;  %v5306_v36 = vld [vmem:[#allocation7 + $0x26c] ss:$16 sps:$4 sm:$0xff]  }
  0x7e   :  { %1570 = vmatprep.subr.bf16.mxu1 %v5147_v41  ;;  %v5204_v22 = vld [vmem:[#allocation7 + $0x684] ss:$16 sps:$4 sm:$0xff]   ;;  %v5202_v24 = vld [vmem:[#allocation7 + $0x680] ss:$16 sps:$4 sm:$0xff]  }
  0x7f   :  { %v5207_v25 = vld [vmem:[#allocation7 + $0x464] ss:$16 sps:$4 sm:$0xff]   ;;  %v5205_v27 = vld [vmem:[#allocation7 + $0x460] ss:$16 sps:$4 sm:$0xff]  }
  0x80   :  { %1530 = vmatpush2.bf16.msra.mxu0 %v5149_v42  ;;  %v5210_v26 = vld [vmem:[#allocation7 + $0x664] ss:$16 sps:$4 sm:$0xff]   ;;  %v5208_v28 = vld [vmem:[#allocation7 + $0x660] ss:$16 sps:$4 sm:$0xff]  }
  0x81   :  { %1571 = vmatpush2.bf16.msra.mxu1 %v5150_v43  ;;  %1531 = vmatprep.subr.bf16.mxu0 %v5151_v44  ;;  %v5213_v29 = vld [vmem:[#allocation7 + $0x444] ss:$16 sps:$4 sm:$0xff]   ;;  %v5211_v31 = vld [vmem:[#allocation7 + $0x440] ss:$16 sps:$4 sm:$0xff]  }
  0x82   :  { %1572 = vmatprep.subr.bf16.mxu1 %v5153_v45  ;;  %v5216_v30 = vld [vmem:[#allocation7 + $0x644] ss:$16 sps:$4 sm:$0xff]   ;;  %v5214_v32 = vld [vmem:[#allocation7 + $0x640] ss:$16 sps:$4 sm:$0xff]   ;;  %v5234_v45 = vld [vmem:[#allocation7 + $0xec] ss:$16 sps:$4 sm:$0xff]  }
  0x83   :  { %v5219_v33 = vld [vmem:[#allocation7 + $0x424] ss:$16 sps:$4 sm:$0xff]   ;;  %v5217_v35 = vld [vmem:[#allocation7 + $0x420] ss:$16 sps:$4 sm:$0xff]  }
  0x84   :  { %1532 = vmatpush2.bf16.msra.mxu0 %v5155_v47  ;;  %v5222_v34 = vld [vmem:[#allocation7 + $0x624] ss:$16 sps:$4 sm:$0xff]   ;;  %v5220_v37 = vld [vmem:[#allocation7 + $0x620] ss:$16 sps:$4 sm:$0xff]  }
  0x85   :  { %1573 = vmatpush2.bf16.msra.mxu1 %v5156_v48  ;;  %1533 = vmatprep.subr.bf16.mxu0 %v5157_v51  ;;  %v5225_v38 = vld [vmem:[#allocation7 + $0x404] ss:$16 sps:$4 sm:$0xff]   ;;  %v5223_v41 = vld [vmem:[#allocation7 + $0x400] ss:$16 sps:$4 sm:$0xff]   ;;  %v5232_v48 = vld [vmem:[#allocation7 + $0xe8] ss:$16 sps:$4 sm:$0xff]  }
  0x86   :  { %1574 = vmatprep.subr.bf16.mxu1 %v5159_v53  ;;  %v5228_v40 = vld [vmem:[#allocation7 + $0x604] ss:$16 sps:$4 sm:$0xff]   ;;  %v5226_v42 = vld [vmem:[#allocation7 + $0x600] ss:$16 sps:$4 sm:$0xff]   ;;  %v5240_v51 = vld [vmem:[#allocation7 + $0xcc] ss:$16 sps:$4 sm:$0xff]  }
  0x87   :  { %v5231_v43 = vld [vmem:[#allocation7 + $0x5e4] ss:$16 sps:$4 sm:$0xff]   ;;  %v5229_v46 = vld [vmem:[#allocation7 + $0x5e0] ss:$16 sps:$4 sm:$0xff]  }
  0x88   :  { %1534 = vmatpush2.bf16.msra.mxu0 %v5161_v54  ;;  %v135_v44 = vld [vmem:[#allocation2 + $0x30] sm:$0xff]  ;;  %v5238_v54 = vld [vmem:[#allocation7 + $0xc8] ss:$16 sps:$4 sm:$0xff]  }
  0x89   :  { %1575 = vmatpush2.bf16.msra.mxu1 %v5162_v55  ;;  %1535 = vmatprep.subr.bf16.mxu0 %v5163_v56  ;;  %v6220_v47 = vpack.c.bf16 %v135_v44, %v135_v44  ;;  %v5237_v50 = vld [vmem:[#allocation7 + $0x5c4] ss:$16 sps:$4 sm:$0xff]   ;;  %v5235_v53 = vld [vmem:[#allocation7 + $0x5c0] ss:$16 sps:$4 sm:$0xff]   ;;  %v5246_v56 = vld [vmem:[#allocation7 + $0xac] ss:$16 sps:$4 sm:$0xff]  }
  0x8a   :  { %1576 = vmatprep.subr.bf16.mxu1 %v5165_v57  ;;  %v5243_v55 = vld [vmem:[#allocation7 + $0x5a4] ss:$16 sps:$4 sm:$0xff]   ;;  %v5241_v57 = vld [vmem:[#allocation7 + $0x5a0] ss:$16 sps:$4 sm:$0xff]   ;;  %v5318_v44 = vld [vmem:[#allocation7 + $0x22c] ss:$16 sps:$4 sm:$0xff]  }
  0x8b   :  { %v5259_v4 = vld [vmem:[#allocation7 + $0x540] ss:$16 sps:$4 sm:$0xff]  }
  0x8c   :  { %1536 = vmatpush2.bf16.msra.mxu0 %v5167_v58  ;;  %v5244_v58 = vld [vmem:[#allocation7 + $0xa8] ss:$16 sps:$4 sm:$0xff]  }
  0x8d   :  { %1577 = vmatpush2.bf16.msra.mxu1 %v5168_v59  ;;  %1537 = vmatprep.subr.bf16.mxu0 %v5169_v60  ;;  %v5249_v59 = vld [vmem:[#allocation7 + $0x584] ss:$16 sps:$4 sm:$0xff]   ;;  %v5252_v60 = vld [vmem:[#allocation7 + $0x8c] ss:$16 sps:$4 sm:$0xff]  }
  0x8e   :  { %1578 = vmatprep.subr.bf16.mxu1 %v5171_v61  ;;  %v5247_v61 = vld [vmem:[#allocation7 + $0x580] ss:$16 sps:$4 sm:$0xff]  }
  0x90   :  { %1538 = vmatpush2.bf16.msra.mxu0 %v5173_v62  ;;  %v5250_v62 = vld [vmem:[#allocation7 + $0x88] ss:$16 sps:$4 sm:$0xff]  }
  0x91   :  { %1579 = vmatpush2.bf16.msra.mxu1 %v5174_v63  ;;  %1539 = vmatprep.subr.bf16.mxu0 %v5175_v0  ;;  %v5255_v63 = vld [vmem:[#allocation7 + $0x564] ss:$16 sps:$4 sm:$0xff]   ;;  %v5258_v0 = vld [vmem:[#allocation7 + $0x6c] ss:$16 sps:$4 sm:$0xff]  }
  0x92   :  { %1580 = vmatprep.subr.bf16.mxu1 %v5177_v1  ;;  %v5253_v1 = vld [vmem:[#allocation7 + $0x560] ss:$16 sps:$4 sm:$0xff]  }
  0x94   :  { %1540 = vmatpush2.bf16.msra.mxu0 %v5179_v2  ;;  %v5261_v2 = vld [vmem:[#allocation7 + $0x544] ss:$16 sps:$4 sm:$0xff]  }
  0x95   :  { %1581 = vmatpush2.bf16.msra.mxu1 %v5180_v3  ;;  %1591 = vmatprep.subr.bf16.mxu0 %v5183_v6  ;;  %v5264_v3 = vld [vmem:[#allocation7 + $0x4c] ss:$16 sps:$4 sm:$0xff]   ;;  %v5267_v6 = vld [vmem:[#allocation7 + $0x524] ss:$16 sps:$4 sm:$0xff]  }
  0x96   :  { %1632 = vmatprep.subr.bf16.mxu1 %v5186_v7  ;;  %v5270_v7 = vld [vmem:[#allocation7 + $0x2c] ss:$16 sps:$4 sm:$0xff]  }
  0x97   :  { %1542 = vmatmul.mubr.bf16.vlgmr.msra.gmra.mxu0 %v6210_v8 }
  0x98   :  { %1583 = vmatmul.mubr.bf16.vlgmr.msra.gmra.mxu1 %v6212_v9  ;;  %1592 = vmatpush1.bf16.msra.mxu0 %v5181_v10  ;;  %v5265_v10 = vld [vmem:[#allocation7 + $0x520] ss:$16 sps:$4 sm:$0xff]  }
  0x99   :  { %1633 = vmatpush1.bf16.msra.mxu1 %v5184_v11  ;;  %1593 = vmatprep.subr.bf16.mxu0 %v5189_v12  ;;  %v5268_v11 = vld [vmem:[#allocation7 + $0x28] ss:$16 sps:$4 sm:$0xff]   ;;  %v5273_v12 = vld [vmem:[#allocation7 + $0x504] ss:$16 sps:$4 sm:$0xff]  }
  0x9a   :  { %1634 = vmatprep.subr.bf16.mxu1 %v5192_v13  ;;  %1664 = vmatprep.mubr.bf16.mxu1 %v6120_v18  ;;  %v5276_v13 = vld [vmem:[#allocation7 + $0xc] ss:$16 sps:$4 sm:$0xff]  }
  0x9b   :  { %1623 = vmatprep.mubr.bf16.mxu0 %v6217_v39 }
  0x9c   :  { %1594 = vmatpush1.bf16.msra.mxu0 %v5187_v14  ;;  %v5271_v14 = vld [vmem:[#allocation7 + $0x500] ss:$16 sps:$4 sm:$0xff]  }
  0x9d   :  { %1635 = vmatpush1.bf16.msra.mxu1 %v5190_v15  ;;  %1595 = vmatprep.subr.bf16.mxu0 %v5195_v16  ;;  %v5274_v15 = vld [vmem:[#allocation7 + $0x8] ss:$16 sps:$4 sm:$0xff]   ;;  %v133_v16 = vld [vmem:[#allocation2 + $0x20] sm:$0xff] }
  0x9e   :  { %1636 = vmatprep.subr.bf16.mxu1 %v5198_v17  ;;  %v5279_v17 = vld [vmem:[#allocation7 + $0x1ec] ss:$16 sps:$4 sm:$0xff]  }
  0xa0   :  { %1596 = vmatpush1.bf16.msra.mxu0 %v5193_v19  ;;  %v5282_v19 = vld [vmem:[#allocation7 + $0x2ec] ss:$16 sps:$4 sm:$0xff]  }
  0xa1   :  { %1637 = vmatpush1.bf16.msra.mxu1 %v5196_v20  ;;  %1597 = vmatprep.subr.bf16.mxu0 %v5201_v21  ;;  %v6224_v20 = vpack.c.bf16 %v133_v16, %v133_v16  ;;  %v5277_v21 = vld [vmem:[#allocation7 + $0x1e8] ss:$16 sps:$4 sm:$0xff]  }
  0xa2   :  { %1638 = vmatprep.subr.bf16.mxu1 %v5204_v22  ;;  %v5280_v22 = vld [vmem:[#allocation7 + $0x2e8] ss:$16 sps:$4 sm:$0xff]  }
  0xa3   :  { %v5364_v16 = vld [vmem:[#allocation7 + $0x428] ss:$16 sps:$4 sm:$0xff]  }
  0xa4   :  { %1598 = vmatpush1.bf16.msra.mxu0 %v5199_v23  ;;  %v5285_v23 = vld [vmem:[#allocation7 + $0x1cc] ss:$16 sps:$4 sm:$0xff]  }
  0xa5   :  { %1639 = vmatpush1.bf16.msra.mxu1 %v5202_v24  ;;  %1599 = vmatprep.subr.bf16.mxu0 %v5207_v25  ;;  %v5288_v24 = vld [vmem:[#allocation7 + $0x2cc] ss:$16 sps:$4 sm:$0xff]   ;;  %v5283_v25 = vld [vmem:[#allocation7 + $0x1c8] ss:$16 sps:$4 sm:$0xff]  }
  0xa6   :  { %1640 = vmatprep.subr.bf16.mxu1 %v5210_v26  ;;  %v5286_v26 = vld [vmem:[#allocation7 + $0x2c8] ss:$16 sps:$4 sm:$0xff]  }
  0xa8   :  { %1600 = vmatpush1.bf16.msra.mxu0 %v5205_v27  ;;  %v5291_v27 = vld [vmem:[#allocation7 + $0x1ac] ss:$16 sps:$4 sm:$0xff]  }
  0xa9   :  { %1641 = vmatpush1.bf16.msra.mxu1 %v5208_v28  ;;  %1601 = vmatprep.subr.bf16.mxu0 %v5213_v29  ;;  %v5294_v28 = vld [vmem:[#allocation7 + $0x2ac] ss:$16 sps:$4 sm:$0xff]   ;;  %v5289_v29 = vld [vmem:[#allocation7 + $0x1a8] ss:$16 sps:$4 sm:$0xff]  }
  0xaa   :  { %1642 = vmatprep.subr.bf16.mxu1 %v5216_v30  ;;  %v5292_v30 = vld [vmem:[#allocation7 + $0x2a8] ss:$16 sps:$4 sm:$0xff]  }
  0xac   :  { %1602 = vmatpush1.bf16.msra.mxu0 %v5211_v31  ;;  %v5297_v31 = vld [vmem:[#allocation7 + $0x18c] ss:$16 sps:$4 sm:$0xff]  }
  0xad   :  { %1643 = vmatpush1.bf16.msra.mxu1 %v5214_v32  ;;  %1603 = vmatprep.subr.bf16.mxu0 %v5219_v33  ;;  %v5300_v32 = vld [vmem:[#allocation7 + $0x28c] ss:$16 sps:$4 sm:$0xff]   ;;  %v5295_v33 = vld [vmem:[#allocation7 + $0x188] ss:$16 sps:$4 sm:$0xff]  }
  0xae   :  { %1644 = vmatprep.subr.bf16.mxu1 %v5222_v34  ;;  %v5298_v34 = vld [vmem:[#allocation7 + $0x288] ss:$16 sps:$4 sm:$0xff]  }
  0xb0   :  { %1604 = vmatpush1.bf16.msra.mxu0 %v5217_v35  ;;  %v5303_v35 = vld [vmem:[#allocation7 + $0x16c] ss:$16 sps:$4 sm:$0xff]  }
  0xb1   :  { %1645 = vmatpush1.bf16.msra.mxu1 %v5220_v37  ;;  %1605 = vmatprep.subr.bf16.mxu0 %v5225_v38  ;;  %v5301_v37 = vld [vmem:[#allocation7 + $0x168] ss:$16 sps:$4 sm:$0xff]   ;;  %v5309_v38 = vld [vmem:[#allocation7 + $0x14c] ss:$16 sps:$4 sm:$0xff]  }
  0xb2   :  { %1646 = vmatprep.subr.bf16.mxu1 %v5228_v40  ;;  %v5312_v40 = vld [vmem:[#allocation7 + $0x24c] ss:$16 sps:$4 sm:$0xff]  }
  0xb4   :  { %1606 = vmatpush1.bf16.msra.mxu0 %v5223_v41  ;;  %v5307_v41 = vld [vmem:[#allocation7 + $0x148] ss:$16 sps:$4 sm:$0xff]  }
  0xb5   :  { %1647 = vmatpush1.bf16.msra.mxu1 %v5226_v42  ;;  %1607 = vmatprep.subr.bf16.mxu0 %v5231_v43  ;;  %v5310_v42 = vld [vmem:[#allocation7 + $0x248] ss:$16 sps:$4 sm:$0xff]   ;;  %v5315_v43 = vld [vmem:[#allocation7 + $0x12c] ss:$16 sps:$4 sm:$0xff]  }
  0xb6   :  { %1673 = vmatprep.subr.bf16.mxu1 %v5234_v45  ;;  %v5313_v45 = vld [vmem:[#allocation7 + $0x128] ss:$16 sps:$4 sm:$0xff]  }
  0xb8   :  { %1665 = vmatmul.mubr.bf16.vlgmr.msra.gmra.mxu1 %v6220_v47  ;;  %1608 = vmatpush2.bf16.msra.mxu0 %v5229_v46  ;;  %v5316_v46 = vld [vmem:[#allocation7 + $0x228] ss:$16 sps:$4 sm:$0xff]  }
  0xb9   :  { %1674 = vmatpush1.bf16.msra.mxu1 %v5232_v48  ;;  %1609 = vmatprep.subr.bf16.mxu0 %v5237_v50  ;;  %v5321_v48 = vld [vmem:[#allocation7 + $0x10c] ss:$16 sps:$4 sm:$0xff]  }
  0xba   :  { %1675 = vmatprep.subr.bf16.mxu1 %v5240_v51  ;;  %1705 = vmatprep.mubr.bf16.mxu1 %v6204_v49  ;;  %v5256_v49 = vld [vmem:[#allocation7 + $0x68] ss:$16 sps:$4 sm:$0xff]   ;;  %v5324_v50 = vld [vmem:[#allocation7 + $0x20c] ss:$16 sps:$4 sm:$0xff]  }
  0xbb   :  { %v5319_v51 = vld [vmem:[#allocation7 + $0x108] ss:$16 sps:$4 sm:$0xff]  }
  0xbc   :  { %1610 = vmatpush2.bf16.msra.mxu0 %v5235_v53  ;;  %v5322_v53 = vld [vmem:[#allocation7 + $0x208] ss:$16 sps:$4 sm:$0xff]  }
  0xbd   :  { %1676 = vmatpush1.bf16.msra.mxu1 %v5238_v54  ;;  %1611 = vmatprep.subr.bf16.mxu0 %v5243_v55  ;;  %v5327_v54 = vld [vmem:[#allocation7 + $0x3ec] ss:$16 sps:$4 sm:$0xff]  }
  0xbe   :  { %1677 = vmatprep.subr.bf16.mxu1 %v5246_v56  ;;  %v5330_v55 = vld [vmem:[#allocation7 + $0x4ec] ss:$16 sps:$4 sm:$0xff]   ;;  %v5325_v56 = vld [vmem:[#allocation7 + $0x3e8] ss:$16 sps:$4 sm:$0xff]  }
  0xc0   :  { %1612 = vmatpush2.bf16.msra.mxu0 %v5241_v57  ;;  %v5328_v57 = vld [vmem:[#allocation7 + $0x4e8] ss:$16 sps:$4 sm:$0xff]  }
  0xc1   :  { %1678 = vmatpush1.bf16.msra.mxu1 %v5244_v58  ;;  %1613 = vmatprep.subr.bf16.mxu0 %v5249_v59  ;;  %v5333_v58 = vld [vmem:[#allocation7 + $0x3cc] ss:$16 sps:$4 sm:$0xff]  }
  0xc2   :  { %1679 = vmatprep.subr.bf16.mxu1 %v5252_v60  ;;  %v5336_v59 = vld [vmem:[#allocation7 + $0x4cc] ss:$16 sps:$4 sm:$0xff]   ;;  %v5331_v60 = vld [vmem:[#allocation7 + $0x3c8] ss:$16 sps:$4 sm:$0xff]  }
  0xc4   :  { %1614 = vmatpush2.bf16.msra.mxu0 %v5247_v61  ;;  %v5334_v61 = vld [vmem:[#allocation7 + $0x4c8] ss:$16 sps:$4 sm:$0xff]  }
  0xc5   :  { %1680 = vmatpush1.bf16.msra.mxu1 %v5250_v62  ;;  %1615 = vmatprep.subr.bf16.mxu0 %v5255_v63  ;;  %v5339_v62 = vld [vmem:[#allocation7 + $0x3ac] ss:$16 sps:$4 sm:$0xff]  }
  0xc6   :  { %1681 = vmatprep.subr.bf16.mxu1 %v5258_v0  ;;  %v5342_v63 = vld [vmem:[#allocation7 + $0x4ac] ss:$16 sps:$4 sm:$0xff]   ;;  %v5337_v0 = vld [vmem:[#allocation7 + $0x3a8] ss:$16 sps:$4 sm:$0xff]  }
  0xc8   :  { %1616 = vmatpush2.bf16.msra.mxu0 %v5253_v1  ;;  %v5340_v1 = vld [vmem:[#allocation7 + $0x4a8] ss:$16 sps:$4 sm:$0xff]  }
  0xc9   :  { %1682 = vmatpush1.bf16.msra.mxu1 %v5256_v49  ;;  %1617 = vmatprep.subr.bf16.mxu0 %v5261_v2  ;;  %v5345_v49 = vld [vmem:[#allocation7 + $0x38c] ss:$16 sps:$4 sm:$0xff]  }
  0xca   :  { %1683 = vmatprep.subr.bf16.mxu1 %v5264_v3  ;;  %v5348_v2 = vld [vmem:[#allocation7 + $0x48c] ss:$16 sps:$4 sm:$0xff]   ;;  %v5343_v3 = vld [vmem:[#allocation7 + $0x388] ss:$16 sps:$4 sm:$0xff]  }
  0xcc   :  { %1618 = vmatpush2.bf16.msra.mxu0 %v5259_v4  ;;  %v5351_v4 = vld [vmem:[#allocation7 + $0x36c] ss:$16 sps:$4 sm:$0xff]  }
  0xcd   :  { %1684 = vmatpush1.bf16.msra.mxu1 %v5262_v5  ;;  %1619 = vmatprep.subr.bf16.mxu0 %v5267_v6  ;;  %v5354_v5 = vld [vmem:[#allocation7 + $0x46c] ss:$16 sps:$4 sm:$0xff]   ;;  %v5349_v6 = vld [vmem:[#allocation7 + $0x368] ss:$16 sps:$4 sm:$0xff]  }
  0xce   :  { %1685 = vmatprep.subr.bf16.mxu1 %v5270_v7  ;;  %v5352_v7 = vld [vmem:[#allocation7 + $0x468] ss:$16 sps:$4 sm:$0xff]  }
  0xd0   :  { %1620 = vmatpush2.bf16.msra.mxu0 %v5265_v10  ;;  %v5357_v10 = vld [vmem:[#allocation7 + $0x34c] ss:$16 sps:$4 sm:$0xff]  }
  0xd1   :  { %1686 = vmatpush1.bf16.msra.mxu1 %v5268_v11  ;;  %1621 = vmatprep.subr.bf16.mxu0 %v5273_v12  ;;  %v5360_v11 = vld [vmem:[#allocation7 + $0x44c] ss:$16 sps:$4 sm:$0xff]   ;;  %v5358_v12 = vld [vmem:[#allocation7 + $0x448] ss:$16 sps:$4 sm:$0xff]  }
  0xd2   :  { %1687 = vmatprep.subr.bf16.mxu1 %v5276_v13  ;;  %v5363_v13 = vld [vmem:[#allocation7 + $0x32c] ss:$16 sps:$4 sm:$0xff]  }
  0xd4   :  { %1622 = vmatpush2.bf16.msra.mxu0 %v5271_v14  ;;  %v5366_v14 = vld [vmem:[#allocation7 + $0x42c] ss:$16 sps:$4 sm:$0xff]  }
  0xd5   :  { %1688 = vmatpush1.bf16.msra.mxu1 %v5274_v15  ;;  %1714 = vmatprep.subr.bf16.mxu0 %v5282_v19  ;;  %v5361_v15 = vld [vmem:[#allocation7 + $0x328] ss:$16 sps:$4 sm:$0xff]   ;;  %v5372_v19 = vld [vmem:[#allocation7 + $0x40c] ss:$16 sps:$4 sm:$0xff]  }
  0xd6   :  { %1689 = vmatprep.subr.bf16.mxu1 %v5279_v17  ;;  %v5369_v17 = vld [vmem:[#allocation7 + $0x30c] ss:$16 sps:$4 sm:$0xff]  }
  0xd7   :  { %1624 = vmatmul.mubr.bf16.vlgmr.msra.gmra.mxu0 %v6224_v20 }
  0xd8   :  { %1715 = vmatpush1.bf16.msra.mxu0 %v5280_v22  ;;  %1746 = vmatprep.mubr.bf16.mxu0 %v6206_v52  ;;  %v5304_v52 = vld [vmem:[#allocation7 + $0x268] ss:$16 sps:$4 sm:$0xff]  }
  0xd9   :  { %1690 = vmatpush2.bf16.msra.mxu1 %v5277_v21  ;;  %1716 = vmatprep.subr.bf16.mxu0 %v5288_v24  ;;  %v5367_v21 = vld [vmem:[#allocation7 + $0x308] ss:$16 sps:$4 sm:$0xff]   ;;  %v5378_v24 = vld [vmem:[#allocation7 + $0x6ec] ss:$16 sps:$4 sm:$0xff]  }
  0xda   :  { %1691 = vmatprep.subr.bf16.mxu1 %v5285_v23  ;;  %v5370_v22 = vld [vmem:[#allocation7 + $0x408] ss:$16 sps:$4 sm:$0xff]   ;;  %v5375_v23 = vld [vmem:[#allocation7 + $0x5ec] ss:$16 sps:$4 sm:$0xff]  }
  0xdc   :  { %1717 = vmatpush1.bf16.msra.mxu0 %v5286_v26  ;;  %v5376_v26 = vld [vmem:[#allocation7 + $0x6e8] ss:$16 sps:$4 sm:$0xff]  }
  0xdd   :  { %1692 = vmatpush2.bf16.msra.mxu1 %v5283_v25  ;;  %1718 = vmatprep.subr.bf16.mxu0 %v5294_v28  ;;  %v5373_v25 = vld [vmem:[#allocation7 + $0x5e8] ss:$16 sps:$4 sm:$0xff]   ;;  %v5384_v28 = vld [vmem:[#allocation7 + $0x6cc] ss:$16 sps:$4 sm:$0xff]  }
  0xde   :  { %1693 = vmatprep.subr.bf16.mxu1 %v5291_v27  ;;  %v5381_v27 = vld [vmem:[#allocation7 + $0x5cc] ss:$16 sps:$4 sm:$0xff]  }
  0xe0   :  { %1719 = vmatpush1.bf16.msra.mxu0 %v5292_v30  ;;  %v5382_v30 = vld [vmem:[#allocation7 + $0x6c8] ss:$16 sps:$4 sm:$0xff]  }
  0xe1   :  { %1694 = vmatpush2.bf16.msra.mxu1 %v5289_v29  ;;  %1720 = vmatprep.subr.bf16.mxu0 %v5300_v32  ;;  %v5379_v29 = vld [vmem:[#allocation7 + $0x5c8] ss:$16 sps:$4 sm:$0xff]   ;;  %v5390_v32 = vld [vmem:[#allocation7 + $0x6ac] ss:$16 sps:$4 sm:$0xff]  }
  0xe2   :  { %1695 = vmatprep.subr.bf16.mxu1 %v5297_v31  ;;  %v5387_v31 = vld [vmem:[#allocation7 + $0x5ac] ss:$16 sps:$4 sm:$0xff]  }
  0xe4   :  { %1721 = vmatpush1.bf16.msra.mxu0 %v5298_v34  ;;  %v5388_v34 = vld [vmem:[#allocation7 + $0x6a8] ss:$16 sps:$4 sm:$0xff]  }
  0xe5   :  { %1696 = vmatpush2.bf16.msra.mxu1 %v5295_v33  ;;  %1722 = vmatprep.subr.bf16.mxu0 %v5306_v36  ;;  %v5385_v33 = vld [vmem:[#allocation7 + $0x5a8] ss:$16 sps:$4 sm:$0xff]   ;;  %v5396_v36 = vld [vmem:[#allocation7 + $0x68c] ss:$16 sps:$4 sm:$0xff]  }
  0xe6   :  { %1697 = vmatprep.subr.bf16.mxu1 %v5303_v35  ;;  %v5393_v35 = vld [vmem:[#allocation7 + $0x58c] ss:$16 sps:$4 sm:$0xff]  }
  0xe8   :  { %1723 = vmatpush1.bf16.msra.mxu0 %v5304_v52  ;;  %v5394_v52 = vld [vmem:[#allocation7 + $0x688] ss:$16 sps:$4 sm:$0xff]  }
  0xe9   :  { %1698 = vmatpush2.bf16.msra.mxu1 %v5301_v37  ;;  %1724 = vmatprep.subr.bf16.mxu0 %v5312_v40  ;;  %v5391_v37 = vld [vmem:[#allocation7 + $0x588] ss:$16 sps:$4 sm:$0xff]  }
  0xea   :  { %1699 = vmatprep.subr.bf16.mxu1 %v5309_v38  ;;  %v5399_v38 = vld [vmem:[#allocation7 + $0x56c] ss:$16 sps:$4 sm:$0xff]   ;;  %v5397_v40 = vld [vmem:[#allocation7 + $0x568] ss:$16 sps:$4 sm:$0xff]  }
  0xec   :  { %1725 = vmatpush1.bf16.msra.mxu0 %v5310_v42  ;;  %v5405_v42 = vld [vmem:[#allocation7 + $0x54c] ss:$16 sps:$4 sm:$0xff]  }
  0xed   :  { %1700 = vmatpush2.bf16.msra.mxu1 %v5307_v41  ;;  %1726 = vmatprep.subr.bf16.mxu0 %v5318_v44  ;;  %v5400_v41 = vld [vmem:[#allocation7 + $0x668] ss:$16 sps:$4 sm:$0xff]  }
  0xee   :  { %1701 = vmatprep.subr.bf16.mxu1 %v5315_v43  ;;  %v5408_v43 = vld [vmem:[#allocation7 + $0x64c] ss:$16 sps:$4 sm:$0xff]   ;;  %v5403_v44 = vld [vmem:[#allocation7 + $0x548] ss:$16 sps:$4 sm:$0xff]  }
  0xf0   :  { %1727 = vmatpush1.bf16.msra.mxu0 %v5316_v46  ;;  %v5411_v46 = vld [vmem:[#allocation7 + $0x52c] ss:$16 sps:$4 sm:$0xff]  }
  0xf1   :  { %1702 = vmatpush2.bf16.msra.mxu1 %v5313_v45  ;;  %1728 = vmatprep.subr.bf16.mxu0 %v5324_v50  ;;  %v5406_v45 = vld [vmem:[#allocation7 + $0x648] ss:$16 sps:$4 sm:$0xff]  }
  0xf2   :  { %1703 = vmatprep.subr.bf16.mxu1 %v5321_v48  ;;  %v5414_v48 = vld [vmem:[#allocation7 + $0x62c] ss:$16 sps:$4 sm:$0xff]   ;;  %v5409_v50 = vld [vmem:[#allocation7 + $0x528] ss:$16 sps:$4 sm:$0xff]  }
  0xf4   :  { %1729 = vmatpush1.bf16.msra.mxu0 %v5322_v53  ;;  %v5417_v53 = vld [vmem:[#allocation7 + $0x50c] ss:$16 sps:$4 sm:$0xff]  }
  0xf5   :  { %1704 = vmatpush2.bf16.msra.mxu1 %v5319_v51  ;;  %1730 = vmatprep.subr.bf16.mxu0 %v5327_v54  ;;  %v5412_v51 = vld [vmem:[#allocation7 + $0x628] ss:$16 sps:$4 sm:$0xff]   ;;  %v5420_v54 = vld [vmem:[#allocation7 + $0x60c] ss:$16 sps:$4 sm:$0xff]  }
  0xf6   :  { %1755 = vmatprep.subr.bf16.mxu1 %v5330_v55  ;;  %v5415_v55 = vld [vmem:[#allocation7 + $0x508] ss:$16 sps:$4 sm:$0xff]  }
  0xf8   :  { %1706 = vmatmul.mubr.bf16.vlgmr.msra.gmra.mxu1 %v6210_v8  ;;  %1731 = vmatpush2.bf16.msra.mxu0 %v5325_v56  ;;  %v5346_v8 = vld [vmem:[#allocation7 + $0x488] ss:$16 sps:$4 sm:$0xff]  }
  0xf9   :  { %1756 = vmatpush1.bf16.msra.mxu1 %v5328_v57  ;;  %1732 = vmatprep.subr.bf16.mxu0 %v5333_v58  ;;  %v5418_v56 = vld [vmem:[#allocation7 + $0x608] ss:$16 sps:$4 sm:$0xff]   ;;  %v5423_v57 = vld [vmem:[#allocation8 + $0x74] ss:$8 sps:$4 sm:$0xff]  }
  0xfa   :  { %1757 = vmatprep.subr.bf16.mxu1 %v5336_v59  ;;  %1787 = vmatprep.mubr.bf16.mxu1 %v6217_v39  ;;  %v5355_v39 = vld [vmem:[#allocation7 + $0x348] ss:$16 sps:$4 sm:$0xff]   ;;  %v5426_v59 = vld [vmem:[#allocation8 + $0x64] ss:$8 sps:$4 sm:$0xff]  }
  0xfb   :  { %v5421_v58 = vld [vmem:[#allocation8 + $0x70] ss:$8 sps:$4 sm:$0xff]  }
  0xfc   :  { %1733 = vmatpush2.bf16.msra.mxu0 %v5331_v60  ;;  %v5424_v60 = vld [vmem:[#allocation8 + $0x60] ss:$8 sps:$4 sm:$0xff]  }
  0xfd   :  { %1758 = vmatpush1.bf16.msra.mxu1 %v5334_v61  ;;  %1734 = vmatprep.subr.bf16.mxu0 %v5339_v62  ;;  %v5429_v61 = vld [vmem:[#allocation8 + $0x54] ss:$8 sps:$4 sm:$0xff]   ;;  %v5427_v62 = vld [vmem:[#allocation8 + $0x50] ss:$8 sps:$4 sm:$0xff]  }
  0xfe   :  { %1759 = vmatprep.subr.bf16.mxu1 %v5342_v63  ;;  %v5432_v63 = vld [vmem:[#allocation8 + $0x44] ss:$8 sps:$4 sm:$0xff]  }
 0x100   :  { %1735 = vmatpush2.bf16.msra.mxu0 %v5337_v0  ;;  %v5469_v0 = vld [vmem:[#allocation8 + $0x170] ss:$8 sps:$4 sm:$0xff]  }
 0x101   :  { %1760 = vmatpush1.bf16.msra.mxu1 %v5340_v1  ;;  %1736 = vmatprep.subr.bf16.mxu0 %v5345_v49  ;;  %v5471_v1 = vld [vmem:[#allocation8 + $0x174] ss:$8 sps:$4 sm:$0xff]   ;;  %v5474_v49 = vld [vmem:[#allocation8 + $0x164] ss:$8 sps:$4 sm:$0xff]  }
 0x102   :  { %1761 = vmatprep.subr.bf16.mxu1 %v5348_v2  ;;  %v5430_v2 = vld [vmem:[#allocation8 + $0x40] ss:$8 sps:$4 sm:$0xff]  }
 0x104   :  { %1737 = vmatpush2.bf16.msra.mxu0 %v5343_v3  ;;  %v5435_v3 = vld [vmem:[#allocation8 + $0x34] ss:$8 sps:$4 sm:$0xff]  }
 0x105   :  { %1762 = vmatpush1.bf16.msra.mxu1 %v5346_v8  ;;  %1738 = vmatprep.subr.bf16.mxu0 %v5351_v4  ;;  %v5472_v8 = vld [vmem:[#allocation8 + $0x160] ss:$8 sps:$4 sm:$0xff]   ;;  %v5477_v4 = vld [vmem:[#allocation8 + $0x154] ss:$8 sps:$4 sm:$0xff]  }
 0x106   :  { %1763 = vmatprep.subr.bf16.mxu1 %v5354_v5  ;;  %v5438_v5 = vld [vmem:[#allocation8 + $0x24] ss:$8 sps:$4 sm:$0xff]  }
 0x108   :  { %1739 = vmatpush2.bf16.msra.mxu0 %v5349_v6  ;;  %v5480_v6 = vld [vmem:[#allocation8 + $0x144] ss:$8 sps:$4 sm:$0xff]  }
 0x109   :  { %1764 = vmatpush1.bf16.msra.mxu1 %v5352_v7  ;;  %1740 = vmatprep.subr.bf16.mxu0 %v5357_v10  ;;  %v5436_v7 = vld [vmem:[#allocation8 + $0x20] ss:$8 sps:$4 sm:$0xff]  }
 0x10a   :  { %1765 = vmatprep.subr.bf16.mxu1 %v5360_v11  ;;  %v5478_v10 = vld [vmem:[#allocation8 + $0x140] ss:$8 sps:$4 sm:$0xff]   ;;  %v5441_v11 = vld [vmem:[#allocation8 + $0x14] ss:$8 sps:$4 sm:$0xff]  }
 0x10c   :  { %1741 = vmatpush2.bf16.msra.mxu0 %v5355_v39  ;;  %v5483_v39 = vld [vmem:[#allocation8 + $0x134] ss:$8 sps:$4 sm:$0xff]  }
 0x10d   :  { %1766 = vmatpush1.bf16.msra.mxu1 %v5358_v12  ;;  %1742 = vmatprep.subr.bf16.mxu0 %v5363_v13  ;;  %v5439_v12 = vld [vmem:[#allocation8 + $0x10] ss:$8 sps:$4 sm:$0xff]  }
 0x10e   :  { %1767 = vmatprep.subr.bf16.mxu1 %v5366_v14  ;;  %v5481_v13 = vld [vmem:[#allocation8 + $0x130] ss:$8 sps:$4 sm:$0xff]   ;;  %v5444_v14 = vld [vmem:[#allocation8 + $0x4] ss:$8 sps:$4 sm:$0xff]  }
 0x110   :  { %1743 = vmatpush2.bf16.msra.mxu0 %v5361_v15  ;;  %v5442_v15 = vld [vmem:[#allocation8] ss:$8 sps:$4 sm:$0xff]  }
 0x111   :  { %1768 = vmatpush1.bf16.msra.mxu1 %v5364_v16  ;;  %1744 = vmatprep.subr.bf16.mxu0 %v5369_v17  ;;  %v5447_v16 = vld [vmem:[#allocation8 + $0xf4] ss:$8 sps:$4 sm:$0xff]   ;;  %v5445_v17 = vld [vmem:[#allocation8 + $0xf0] ss:$8 sps:$4 sm:$0xff]  }
 0x112   :  { %1769 = vmatprep.subr.bf16.mxu1 %v5372_v19  ;;  %v5450_v19 = vld [vmem:[#allocation8 + $0xe4] ss:$8 sps:$4 sm:$0xff]  }
 0x114   :  { %1745 = vmatpush2.bf16.msra.mxu0 %v5367_v21  ;;  %v5486_v21 = vld [vmem:[#allocation8 + $0x124] ss:$8 sps:$4 sm:$0xff]  }
 0x115   :  { %1770 = vmatpush1.bf16.msra.mxu1 %v5370_v22  ;;  %1796 = vmatprep.subr.bf16.mxu0 %v5378_v24  ;;  %v5448_v22 = vld [vmem:[#allocation8 + $0xe0] ss:$8 sps:$4 sm:$0xff]  }
 0x116   :  { %1771 = vmatprep.subr.bf16.mxu1 %v5375_v23  ;;  %v5484_v23 = vld [vmem:[#allocation8 + $0x120] ss:$8 sps:$4 sm:$0xff]  }
 0x117   :  { %1747 = vmatmul.mubr.bf16.vlgmr.msra.gmra.mxu0 %v6212_v9  ;;  %v5402_v9 = vld [vmem:[#allocation7 + $0x66c] ss:$16 sps:$4 sm:$0xff]  }
 0x118   :  { %1797 = vmatpush1.bf16.msra.mxu0 %v5376_v26  ;;  %1828 = vmatprep.mubr.bf16.mxu0 %v6120_v18  ;;  %v5453_v26 = vld [vmem:[#allocation8 + $0xd4] ss:$8 sps:$4 sm:$0xff]  }
 0x119   :  { %1772 = vmatpush2.bf16.msra.mxu1 %v5373_v25  ;;  %1798 = vmatprep.subr.bf16.mxu0 %v5384_v28 }
 0x11a   :  { %1773 = vmatprep.subr.bf16.mxu1 %v5381_v27 }
 0x11c   :  { %1799 = vmatpush1.bf16.msra.mxu0 %v5382_v30  ;;  %v5451_v30 = vld [vmem:[#allocation8 + $0xd0] ss:$8 sps:$4 sm:$0xff]  }
 0x11d   :  { %1774 = vmatpush2.bf16.msra.mxu1 %v5379_v29  ;;  %1800 = vmatprep.subr.bf16.mxu0 %v5390_v32  ;;  %v5489_v29 = vld [vmem:[#allocation8 + $0x114] ss:$8 sps:$4 sm:$0xff]  }
 0x11e   :  { %1775 = vmatprep.subr.bf16.mxu1 %v5387_v31  ;;  %v5487_v31 = vld [vmem:[#allocation8 + $0x110] ss:$8 sps:$4 sm:$0xff]  }
 0x120   :  { %1801 = vmatpush1.bf16.msra.mxu0 %v5388_v34 }
 0x121   :  { %1776 = vmatpush2.bf16.msra.mxu1 %v5385_v33  ;;  %1802 = vmatprep.subr.bf16.mxu0 %v5396_v36  ;;  %v5456_v36 = vld [vmem:[#allocation8 + $0xc4] ss:$8 sps:$4 sm:$0xff]  }
 0x122   :  { %1777 = vmatprep.subr.bf16.mxu1 %v5393_v35 }
 0x124   :  { %1803 = vmatpush1.bf16.msra.mxu0 %v5394_v52  ;;  %v5492_v52 = vld [vmem:[#allocation8 + $0x104] ss:$8 sps:$4 sm:$0xff]  }
 0x125   :  { %1778 = vmatpush2.bf16.msra.mxu1 %v5391_v37  ;;  %1804 = vmatprep.subr.bf16.mxu0 %v5402_v9  ;;  %v5490_v37 = vld [vmem:[#allocation8 + $0x100] ss:$8 sps:$4 sm:$0xff]  }
 0x126   :  { %1779 = vmatprep.subr.bf16.mxu1 %v5399_v38  ;;  %v5495_v38 = vld [vmem:[#allocation8 + $0x1f4] ss:$8 sps:$4 sm:$0xff]   ;;  %v5454_v9 = vld [vmem:[#allocation8 + $0xc0] ss:$8 sps:$4 sm:$0xff]  }
 0x128   :  { %1805 = vmatpush1.bf16.msra.mxu0 %v5400_v41  ;;  %v5493_v41 = vld [vmem:[#allocation8 + $0x1f0] ss:$8 sps:$4 sm:$0xff]  }
 0x129   :  { %1780 = vmatpush2.bf16.msra.mxu1 %v5397_v40  ;;  %1806 = vmatprep.subr.bf16.mxu0 %v5408_v43  ;;  %v5459_v40 = vld [vmem:[#allocation8 + $0xb4] ss:$8 sps:$4 sm:$0xff]   ;;  %v5457_v43 = vld [vmem:[#allocation8 + $0xb0] ss:$8 sps:$4 sm:$0xff]  }
 0x12a   :  { %1781 = vmatprep.subr.bf16.mxu1 %v5405_v42  ;;  %v5498_v42 = vld [vmem:[#allocation8 + $0x1e4] ss:$8 sps:$4 sm:$0xff]  }
 0x12c   :  { %1807 = vmatpush1.bf16.msra.mxu0 %v5406_v45  ;;  %v5462_v45 = vld [vmem:[#allocation8 + $0xa4] ss:$8 sps:$4 sm:$0xff]  }
 0x12d   :  { %1782 = vmatpush2.bf16.msra.mxu1 %v5403_v44  ;;  %1808 = vmatprep.subr.bf16.mxu0 %v5414_v48  ;;  %v5496_v44 = vld [vmem:[#allocation8 + $0x1e0] ss:$8 sps:$4 sm:$0xff]  }
 0x12e   :  { %1783 = vmatprep.subr.bf16.mxu1 %v5411_v46  ;;  %v5501_v46 = vld [vmem:[#allocation8 + $0x1d4] ss:$8 sps:$4 sm:$0xff]   ;;  %v5460_v48 = vld [vmem:[#allocation8 + $0xa0] ss:$8 sps:$4 sm:$0xff]  }
 0x130   :  { %1809 = vmatpush1.bf16.msra.mxu0 %v5412_v51  ;;  %v5465_v51 = vld [vmem:[#allocation8 + $0x94] ss:$8 sps:$4 sm:$0xff]  }
 0x131   :  { %1784 = vmatpush2.bf16.msra.mxu1 %v5409_v50  ;;  %1810 = vmatprep.subr.bf16.mxu0 %v5420_v54  ;;  %v5499_v50 = vld [vmem:[#allocation8 + $0x1d0] ss:$8 sps:$4 sm:$0xff]  }
 0x132   :  { %1785 = vmatprep.subr.bf16.mxu1 %v5417_v53  ;;  %v5504_v53 = vld [vmem:[#allocation8 + $0x1c4] ss:$8 sps:$4 sm:$0xff]   ;;  %v5463_v54 = vld [vmem:[#allocation8 + $0x90] ss:$8 sps:$4 sm:$0xff]  }
 0x134   :  { %1811 = vmatpush1.bf16.msra.mxu0 %v5418_v56  ;;  %v5468_v56 = vld [vmem:[#allocation8 + $0x84] ss:$8 sps:$4 sm:$0xff]  }
 0x135   :  { %1786 = vmatpush2.bf16.msra.mxu1 %v5415_v55  ;;  %2241 = vmatprep.subr.bf16.mxu0 %v5423_v57  ;;  %v5502_v55 = vld [vmem:[#allocation8 + $0x1c0] ss:$8 sps:$4 sm:$0xff]   ;;  %v5507_v57 = vld [vmem:[#allocation8 + $0x1b4] ss:$8 sps:$4 sm:$0xff]  }
 0x136   :  { %2282 = vmatprep.subr.bf16.mxu1 %v5471_v1  ;;  %v5511_v1 = vld [vmem:[#allocation8 + $0x190] ss:$8 sps:$4 sm:$0xff]  }
 0x137   :  { %1829 = vmatmul.mubr.bf16.vlgmr.msra.gmra.mxu0 %v6220_v47  ;;  %v5433_v47 = vld [vmem:[#allocation8 + $0x30] ss:$8 sps:$4 sm:$0xff]  }
 0x138   :  { %1788 = vmatmul.mubr.bf16.vlgmr.msra.gmra.mxu1 %v6224_v20  ;;  %2242 = vmatpush1.bf16.msra.mxu0 %v5421_v58  ;;  %v5475_v20 = vld [vmem:[#allocation8 + $0x150] ss:$8 sps:$4 sm:$0xff]   ;;  %v5466_v58 = vld [vmem:[#allocation8 + $0x80] ss:$8 sps:$4 sm:$0xff]  }
 0x139   :  { %2243 = vmatprep.subr.bf16.mxu0 %v5426_v59  ;;  %2283 = vmatpush1.bf16.msra.mxu1 %v5469_v0  ;;  %v5505_v59 = vld [vmem:[#allocation8 + $0x1b0] ss:$8 sps:$4 sm:$0xff]   ;;  %v5513_v0 = vld [vmem:[#allocation8 + $0x194] ss:$8 sps:$4 sm:$0xff]  }
 0x13a   :  { %2284 = vmatprep.subr.bf16.mxu1 %v5474_v49 }
 0x13c   :  { %2244 = vmatpush1.bf16.msra.mxu0 %v5424_v60  ;;  %v5510_v60 = vld [vmem:[#allocation8 + $0x1a4] ss:$8 sps:$4 sm:$0xff]  }
 0x13d   :  { %2245 = vmatprep.subr.bf16.mxu0 %v5429_v61  ;;  %2285 = vmatpush1.bf16.msra.mxu1 %v5472_v8  ;;  %v5508_v61 = vld [vmem:[#allocation8 + $0x1a0] ss:$8 sps:$4 sm:$0xff]  }
 0x13e   :  { %2286 = vmatprep.subr.bf16.mxu1 %v5477_v4  ;;  %v5514_v8 = vld [vmem:[#allocation8 + $0x180] ss:$8 sps:$4 sm:$0xff]   ;;  %v369_v4 = vlaneseq }
 0x140   :  { %2246 = vmatpush1.bf16.msra.mxu0 %v5427_v62 }
 0x141   :  { %2247 = vmatprep.subr.bf16.mxu0 %v5432_v63  ;;  %2287 = vmatpush1.bf16.msra.mxu1 %v5475_v20 }
 0x142   :  { %2288 = vmatprep.subr.bf16.mxu1 %v5480_v6 }
 0x144   :  { %2248 = vmatpush1.bf16.msra.mxu0 %v5430_v2 }
 0x145   :  { %2249 = vmatprep.subr.bf16.mxu0 %v5435_v3  ;;  %2289 = vmatpush1.bf16.msra.mxu1 %v5478_v10  ;;  %v5516_v3 = vld [vmem:[#allocation8 + $0x184] ss:$8 sps:$4 sm:$0xff]  }
 0x146   :  { %2290 = vmatprep.subr.bf16.mxu1 %v5483_v39 }
 0x148   :  { %2250 = vmatpush1.bf16.msra.mxu0 %v5433_v47  ;;  %v6242_v47 = vshrl.u32 %v369_v4, 7  ;;  %v5531_v4 = vld [vmem:[#allocation10 + $0xa4] ss:$16 sps:$4 sm:$0xff]  }
 0x149   :  { %2251 = vmatprep.subr.bf16.mxu0 %v5438_v5  ;;  %2291 = vmatpush1.bf16.msra.mxu1 %v5481_v13  ;;  %v367_v5 = vld [vmem:[%s6330_s3] sm:$0xf] }
 0x14a   :  { %2292 = vmatprep.subr.bf16.mxu1 %v5486_v21  ;;  %v6245_v20 = vsub.s32 0, %v6242_v47  ;;  %v6251_v6 = vsub.s32 1, %v6242_v47 }
 0x14c   :  { %2252 = vmatpush1.bf16.msra.mxu0 %v5436_v7  ;;  %v372_v7 = vrot.slane %v367_v5, %v6245_v20  ;;  %v376_v10 = vrot.slane %v367_v5, %v6251_v6 }
 0x14d   :  { %2253 = vmatprep.subr.bf16.mxu0 %v5441_v11  ;;  %2293 = vmatpush1.bf16.msra.mxu1 %v5484_v23 }
 0x14e   :  { %2294 = vmatprep.subr.bf16.mxu1 %v5489_v29 }
 0x150   :  { %2254 = vmatpush1.bf16.msra.mxu0 %v5439_v12 }
 0x151   :  { %2255 = vmatprep.subr.bf16.mxu0 %v5444_v14  ;;  %2295 = vmatpush1.bf16.msra.mxu1 %v5487_v31 }
 0x152   :  { %2296 = vmatprep.subr.bf16.mxu1 %v5492_v52  ;;  %v5522_v52 = vld [vmem:[#allocation10 + $0xec] ss:$16 sps:$4 sm:$0xff]  }
 0x154   :  { %2256 = vmatpush1.bf16.msra.mxu0 %v5442_v15 }
 0x155   :  { %2257 = vmatprep.subr.bf16.mxu0 %v5447_v16  ;;  %2297 = vmatpush1.bf16.msra.mxu1 %v5490_v37  ;;  %v5519_v37 = vld [vmem:[#allocation10 + $0xe4] ss:$16 sps:$4 sm:$0xff]  }
 0x156   :  { %2298 = vmatprep.subr.bf16.mxu1 %v5495_v38  ;;  %v6261_v38 = vsub.s32 2, %v6242_v47 }
 0x157   :  { %v6234_v24 = vpop.f32.mrf.mxu0 }
 0x158   :  { %v6236_v25 = vpop.f32.mrf.mxu1  ;;  %2258 = vmatpush2.bf16.msra.mxu0 %v5445_v17  ;;  %v1544_v11 = vadd.f32 %v6234_v24, %v372_v7  ;;  %v5529_v7 = vld [vmem:[#allocation10 + $0xa0] ss:$16 sps:$4 sm:$0xff]  }
 0x159   :  { %v6238_v27 = vpop.f32.mrf.mxu0  ;;  %2259 = vmatprep.subr.bf16.mxu0 %v5450_v19  ;;  %2299 = vmatpush2.bf16.msra.mxu1 %v5493_v41 }
 0x15a   :  { %v6240_v28 = vpop.f32.mrf.mxu1  ;;  %2300 = vmatprep.subr.bf16.mxu1 %v5498_v42  ;;  %v1546_v39 = vadd.f32 %v6238_v27, %v376_v10  ;;  %v1585_v12 = vadd.f32 %v6236_v25, %v1544_v11  ;;  %v5532_v10 = vld [vmem:[#allocation10 + $0xa8] ss:$16 sps:$4 sm:$0xff]   ;;  %v5537_v11 = vld [vmem:[#allocation10 + $0x84] ss:$16 sps:$4 sm:$0xff]  }
 0x15b   :  { %v1547_v32 = vpop.f32.mrf.mxu0 }
 0x15c   :  { %v1588_v33 = vpop.f32.mrf.mxu1  ;;  %2260 = vmatpush2.bf16.msra.mxu0 %v5448_v22  ;;  %v1587_v14 = vadd.f32 %v6240_v28, %v1546_v39  ;;  %v5540_v39 = vld [vmem:[#allocation10 + $0x8c] ss:$16 sps:$4 sm:$0xff]  }
 0x15d   :  { %v1548_v34 = vpop.f32.mrf.mxu0  ;;  %2261 = vmatprep.subr.bf16.mxu0 %v5453_v26  ;;  %2301 = vmatpush2.bf16.msra.mxu1 %v5496_v44 }
 0x15e   :  { %v1589_v35 = vpop.f32.mrf.mxu1  ;;  %2302 = vmatprep.subr.bf16.mxu1 %v5501_v46 }
 0x160   :  { %2262 = vmatpush2.bf16.msra.mxu0 %v5451_v30 }
 0x161   :  { %2263 = vmatprep.subr.bf16.mxu0 %v5456_v36  ;;  %2303 = vmatpush2.bf16.msra.mxu1 %v5499_v50  ;;  %v5517_v36 = vld [vmem:[#allocation10 + $0xe0] ss:$16 sps:$4 sm:$0xff]  }
 0x162   :  { %2304 = vmatprep.subr.bf16.mxu1 %v5504_v53 }
 0x164   :  { %2264 = vmatpush2.bf16.msra.mxu0 %v5454_v9  ;;  %v6264_v9 = vsub.s32 3, %v6242_v47 }
 0x165   :  { %2265 = vmatprep.subr.bf16.mxu0 %v5459_v40  ;;  %2305 = vmatpush2.bf16.msra.mxu1 %v5502_v55  ;;  %v380_v40 = vrot.slane %v367_v5, %v6261_v38 }
 0x166   :  { %2306 = vmatprep.subr.bf16.mxu1 %v5507_v57  ;;  %v384_v41 = vrot.slane %v367_v5, %v6264_v9  ;;  %v5534_v5 = vld [vmem:[#allocation10 + $0xac] ss:$16 sps:$4 sm:$0xff]  }
 0x168   :  { %2266 = vmatpush2.bf16.msra.mxu0 %v5457_v43 }
 0x169   :  { %2267 = vmatprep.subr.bf16.mxu0 %v5462_v45  ;;  %2307 = vmatpush2.bf16.msra.mxu1 %v5505_v59 }
 0x16a   :  { %2308 = vmatprep.subr.bf16.mxu1 %v5510_v60 }
 0x16c   :  { %2268 = vmatpush2.bf16.msra.mxu0 %v5460_v48 }
 0x16d   :  { %2269 = vmatprep.subr.bf16.mxu0 %v5465_v51  ;;  %2309 = vmatpush2.bf16.msra.mxu1 %v5508_v61 }
 0x16e   :  { %2310 = vmatprep.subr.bf16.mxu1 %v5513_v0  ;;  %v5520_v0 = vld [vmem:[#allocation10 + $0xe8] ss:$16 sps:$4 sm:$0xff]  }
 0x170   :  { %2270 = vmatpush2.bf16.msra.mxu0 %v5463_v54 }
 0x171   :  { %2271 = vmatprep.subr.bf16.mxu0 %v5468_v56  ;;  %2311 = vmatpush2.bf16.msra.mxu1 %v5511_v1 }
 0x172   :  { %2312 = vmatprep.subr.bf16.mxu1 %v5516_v3  ;;  %v5523_v3 = vld [vmem:[#allocation10 + $0xc0] ss:$16 sps:$4 sm:$0xff]  }
 0x174   :  { %2272 = vmatpush2.bf16.msra.mxu0 %v5466_v58 }
 0x175   :  { %2313 = vmatpush2.bf16.msra.mxu1 %v5514_v8  ;;  %2544 = vmatprep.subr.bf16.mxu0 %v5519_v37  ;;  %v5526_v8 = vld [vmem:[#allocation10 + $0xc8] ss:$16 sps:$4 sm:$0xff]   ;;  %v1909_v37 = vld [vmem:[%s6332_s5] sm:$0x3] }
 0x176   :  { %2585 = vmatprep.subr.bf16.mxu1 %v5522_v52  ;;  %v1914_v52 = vrot.slane %v1909_v37, %v6245_v20 }
 0x178   :  { %v1666_v62 = vpop.f32.mrf.mxu1 }
 0x17a   :  { %v1668_v63 = vpop.f32.mrf.mxu1 }
 0x17c   :  { %v1670_v49 = vpop.f32.mrf.mxu1 }
 0x17d   :  { %v5525_v49 = vld [vmem:[#allocation10 + $0xc4] ss:$16 sps:$4 sm:$0xff]  }
 0x17e   :  { %v1671_v2 = vpop.f32.mrf.mxu1 }
 0x17f   :  { %v5528_v2 = vld [vmem:[#allocation10 + $0xcc] ss:$16 sps:$4 sm:$0xff]  }
 0x197   :  { %v1625_v13 = vpop.f32.mrf.mxu0 }
 0x198   :  { %v1626_v15 = vadd.f32 %v1625_v13, %v1585_v12  ;;  %v5535_v12 = vld [vmem:[#allocation10 + $0x80] ss:$16 sps:$4 sm:$0xff]   ;;  %v5543_v13 = vld [vmem:[#allocation10 + $0x64] ss:$16 sps:$4 sm:$0xff]  }
 0x199   :  { %v1627_v16 = vpop.f32.mrf.mxu0 }
 0x19a   :  { %v1667_v17 = vadd.f32 %v1666_v62, %v1626_v15  ;;  %v1628_v19 = vadd.f32 %v1627_v16, %v1587_v14  ;;  %v5541_v14 = vld [vmem:[#allocation10 + $0x60] ss:$16 sps:$4 sm:$0xff]   ;;  %v5544_v15 = vld [vmem:[#allocation10 + $0x68] ss:$16 sps:$4 sm:$0xff]   ;;  %v5546_v16 = vld [vmem:[#allocation10 + $0x6c] ss:$16 sps:$4 sm:$0xff]  }
 0x19b   :  { %v1629_v21 = vpop.f32.mrf.mxu0 }
 0x19c   :  { %v1669_v22 = vadd.f32 %v1668_v63, %v1628_v19  ;;  %v1837_v23 = vmax.f32 %v1667_v17, 0.0  ;;  %v5549_v17 = vld [vmem:[#allocation10 + $0x44] ss:$16 sps:$4 sm:$0xff]   ;;  %v5552_v19 = vld [vmem:[#allocation10 + $0x4c] ss:$16 sps:$4 sm:$0xff]  }
 0x19d   :  { %v1630_v26 = vpop.f32.mrf.mxu0  ;;  %v5547_v21 = vld [vmem:[#allocation10 + $0x40] ss:$16 sps:$4 sm:$0xff]  }
 0x19e   :  { %v1838_v29 = vmax.f32 %v1669_v22, 0.0  ;;  %v1841_v31 = vpack.c.bf16 %v1837_v23, %v1837_v23  ;;  %v5550_v22 = vld [vmem:[#allocation10 + $0x48] ss:$16 sps:$4 sm:$0xff]   ;;  %v5555_v23 = vld [vmem:[#allocation10 + $0x24] ss:$16 sps:$4 sm:$0xff]  }
 0x19f   :  { %v5558_v26 = vld [vmem:[#allocation10 + $0x2c] ss:$16 sps:$4 sm:$0xff]  }
 0x1a0   :  { %v1842_v30 = vpack.c.bf16 %v1838_v29, %v1838_v29  ;;  %v5553_v29 = vld [vmem:[#allocation10 + $0x20] ss:$16 sps:$4 sm:$0xff]  }
 0x1a2   :  { %2273 = vmatprep.mubr.bf16.mxu0 %v1842_v30  ;;  %v5556_v30 = vld [vmem:[#allocation10 + $0x28] ss:$16 sps:$4 sm:$0xff]  }
 0x1a3   :  { %2274 = vmatmul.mubr.bf16.vlgmr.msra.gmra.mxu0 %v1841_v31  ;;  %v5561_v31 = vld [vmem:[#allocation10 + $0x4] ss:$16 sps:$4 sm:$0xff]  }
 0x1a4   :  { %2576 = vmatprep.mubr.bf16.mxu0 %v6120_v18  ;;  %2545 = vmatpush1.bf16.msra.mxu0 %v5517_v36 }
 0x1a5   :  { %2546 = vmatprep.subr.bf16.mxu0 %v5525_v49  ;;  %v5582_v49 = vld [vmem:[#allocation13 + $0x49c] ss:$28 sps:$4 sm:$0xff]  }
 0x1a8   :  { %2547 = vmatpush1.bf16.msra.mxu0 %v5523_v3  ;;  %v5580_v3 = vld [vmem:[#allocation13 + $0x498] ss:$28 sps:$4 sm:$0xff]  }
 0x1a9   :  { %2548 = vmatprep.subr.bf16.mxu0 %v5531_v4  ;;  %v5588_v4 = vld [vmem:[#allocation13 + $0x464] ss:$28 sps:$4 sm:$0xff]  }
 0x1ac   :  { %2549 = vmatpush1.bf16.msra.mxu0 %v5529_v7  ;;  %v5586_v7 = vld [vmem:[#allocation13 + $0x460] ss:$28 sps:$4 sm:$0xff]  }
 0x1ad   :  { %2550 = vmatprep.subr.bf16.mxu0 %v5537_v11  ;;  %v5594_v11 = vld [vmem:[#allocation13 + $0x42c] ss:$28 sps:$4 sm:$0xff]  }
 0x1b0   :  { %2551 = vmatpush1.bf16.msra.mxu0 %v5535_v12  ;;  %v5592_v12 = vld [vmem:[#allocation13 + $0x428] ss:$28 sps:$4 sm:$0xff]  }
 0x1b1   :  { %2552 = vmatprep.subr.bf16.mxu0 %v5543_v13  ;;  %v5600_v13 = vld [vmem:[#allocation13 + $0x3f4] ss:$28 sps:$4 sm:$0xff]  }
 0x1b4   :  { %2553 = vmatpush1.bf16.msra.mxu0 %v5541_v14  ;;  %v5595_v14 = vld [vmem:[#allocation13 + $0x70] ss:$28 sps:$4 sm:$0xff]  }
 0x1b5   :  { %2554 = vmatprep.subr.bf16.mxu0 %v5549_v17  ;;  %v5606_v17 = vld [vmem:[#allocation13 + $0x3bc] ss:$28 sps:$4 sm:$0xff]  }
 0x1b8   :  { %v1707_v24 = vpop.f32.mrf.mxu1  ;;  %2555 = vmatpush1.bf16.msra.mxu0 %v5547_v21  ;;  %v5604_v21 = vld [vmem:[#allocation13 + $0x3b8] ss:$28 sps:$4 sm:$0xff]  }
 0x1b9   :  { %v1708_v42 = vadd.f32 %v1707_v24, %v380_v40  ;;  %2556 = vmatprep.subr.bf16.mxu0 %v5555_v23  ;;  %v5564_v24 = vld [vmem:[#allocation10 + $0xc] ss:$16 sps:$4 sm:$0xff]   ;;  %v1918_v40 = vrot.slane %v1909_v37, %v6251_v6  ;;  %v5612_v23 = vld [vmem:[#allocation13 + $0x384] ss:$28 sps:$4 sm:$0xff]  }
 0x1ba   :  { %v1709_v25 = vpop.f32.mrf.mxu1  ;;  %v5628_v37 = vld [vmem:[#allocation13 + $0x658] ss:$28 sps:$4 sm:$0xff]  }
 0x1bb   :  { %v1710_v43 = vadd.f32 %v1709_v25, %v384_v41  ;;  %v5559_v25 = vld [vmem:[#allocation10] ss:$16 sps:$4 sm:$0xff]  }
 0x1bc   :  { %v1711_v27 = vpop.f32.mrf.mxu1  ;;  %2557 = vmatpush1.bf16.msra.mxu0 %v5553_v29  ;;  %v5610_v29 = vld [vmem:[#allocation13 + $0x380] ss:$28 sps:$4 sm:$0xff]  }
 0x1bd   :  { %v5562_v27 = vld [vmem:[#allocation10 + $0x8] ss:$16 sps:$4 sm:$0xff]   ;;  %2558 = vmatprep.subr.bf16.mxu0 %v5561_v31  ;;  %v5618_v31 = vld [vmem:[#allocation13 + $0x6cc] ss:$28 sps:$4 sm:$0xff]  }
 0x1be   :  { %v1712_v32 = vpop.f32.mrf.mxu1 }
 0x1bf   :  { %v5567_v32 = vld [vmem:[#allocation13 + $0x18c] ss:$28 sps:$4 sm:$0xff]  }
 0x1c0   :  { %2559 = vmatpush1.bf16.msra.mxu0 %v5559_v25  ;;  %v5616_v25 = vld [vmem:[#allocation13 + $0x6c8] ss:$28 sps:$4 sm:$0xff]  }
 0x1c1   :  { %4079 = vmatprep.subr.bf16.mxu0 %v5567_v32  ;;  %v5624_v32 = vld [vmem:[#allocation13 + $0x694] ss:$28 sps:$4 sm:$0xff]  }
 0x1d7   :  { %v1748_v28 = vpop.f32.mrf.mxu0 }
 0x1d8   :  { %v1749_v44 = vadd.f32 %v1748_v28, %v1708_v42  ;;  %v5570_v28 = vld [vmem:[#allocation13 + $0x50c] ss:$28 sps:$4 sm:$0xff]  }
 0x1d9   :  { %v1750_v33 = vpop.f32.mrf.mxu0 }
 0x1da   :  { %v1751_v48 = vadd.f32 %v1750_v33, %v1710_v43 }
 0x1db   :  { %v1752_v34 = vpop.f32.mrf.mxu0 }
 0x1dd   :  { %v1753_v35 = vpop.f32.mrf.mxu0 }
 0x1f7   :  { %v1830_v46 = vpop.f32.mrf.mxu0 }
 0x1f8   :  { %v1789_v45 = vpop.f32.mrf.mxu1 }
 0x1f9   :  { %v1790_v50 = vadd.f32 %v1789_v45, %v1749_v44  ;;  %v1832_v53 = vpop.f32.mrf.mxu0 }
 0x1fa   :  { %v1791_v51 = vpop.f32.mrf.mxu1 }
 0x1fb   :  { %v1831_v54 = vadd.f32 %v1830_v46, %v1790_v50  ;;  %v1792_v55 = vadd.f32 %v1791_v51, %v1751_v48  ;;  %v1834_v57 = vpop.f32.mrf.mxu0 }
 0x1fc   :  { %v1793_v56 = vpop.f32.mrf.mxu1 }
 0x1fd   :  { %v1833_v58 = vadd.f32 %v1832_v53, %v1792_v55  ;;  %v1839_v59 = vmax.f32 %v1831_v54, 0.0  ;;  %v1835_v61 = vpop.f32.mrf.mxu0  ;;  %v2323_v54 = vld [vmem:[#allocation5] sm:$0xff] }
 0x1fe   :  { %v1794_v60 = vpop.f32.mrf.mxu1  ;;  %v5573_v61 = vld [vmem:[#allocation13 + $0x154] ss:$28 sps:$4 sm:$0xff]  }
 0x1ff   :  { %v1840_v62 = vmax.f32 %v1833_v58, 0.0  ;;  %v1843_v1 = vpack.c.bf16 %v1839_v59, %v1839_v59  ;;  %v5565_v58 = vld [vmem:[#allocation13 + $0x188] ss:$28 sps:$4 sm:$0xff]  }
 0x200   :  { %v5568_v59 = vld [vmem:[#allocation13 + $0x508] ss:$28 sps:$4 sm:$0xff]  }
 0x201   :  { %v1844_v63 = vpack.c.bf16 %v1840_v62, %v1840_v62  ;;  %v5576_v62 = vld [vmem:[#allocation13 + $0x4d4] ss:$28 sps:$4 sm:$0xff]  }
 0x203   :  { %2314 = vmatprep.mubr.bf16.mxu1 %v1844_v63  ;;  %v5571_v63 = vld [vmem:[#allocation13 + $0x150] ss:$28 sps:$4 sm:$0xff]  }
 0x204   :  { %2315 = vmatmul.mubr.bf16.vlgmr.msra.gmra.mxu1 %v1843_v1  ;;  %v5579_v1 = vld [vmem:[#allocation13 + $0x11c] ss:$28 sps:$4 sm:$0xff]  }
 0x205   :  { %2586 = vmatpush1.bf16.msra.mxu1 %v5520_v0  ;;  %2617 = vmatprep.mubr.bf16.mxu1 %v6120_v18  ;;  %v5538_v18 = vld [vmem:[#allocation10 + $0x88] ss:$16 sps:$4 sm:$0xff]   ;;  %v5574_v0 = vld [vmem:[#allocation13 + $0x4d0] ss:$28 sps:$4 sm:$0xff]  }
 0x206   :  { %2587 = vmatprep.subr.bf16.mxu1 %v5528_v2  ;;  %v5577_v2 = vld [vmem:[#allocation13 + $0x118] ss:$28 sps:$4 sm:$0xff]  }
 0x209   :  { %2588 = vmatpush1.bf16.msra.mxu1 %v5526_v8  ;;  %v5585_v8 = vld [vmem:[#allocation13 + $0xe4] ss:$28 sps:$4 sm:$0xff]  }
 0x20a   :  { %2589 = vmatprep.subr.bf16.mxu1 %v5534_v5  ;;  %v5583_v5 = vld [vmem:[#allocation13 + $0xe0] ss:$28 sps:$4 sm:$0xff]  }
 0x20d   :  { %2590 = vmatpush1.bf16.msra.mxu1 %v5532_v10  ;;  %v5591_v10 = vld [vmem:[#allocation13 + $0xac] ss:$28 sps:$4 sm:$0xff]  }
 0x20e   :  { %2591 = vmatprep.subr.bf16.mxu1 %v5540_v39  ;;  %v5589_v39 = vld [vmem:[#allocation13 + $0xa8] ss:$28 sps:$4 sm:$0xff]  }
 0x211   :  { %2592 = vmatpush1.bf16.msra.mxu1 %v5538_v18  ;;  %v5597_v18 = vld [vmem:[#allocation13 + $0x74] ss:$28 sps:$4 sm:$0xff]  }
 0x212   :  { %2593 = vmatprep.subr.bf16.mxu1 %v5546_v16  ;;  %v5603_v16 = vld [vmem:[#allocation13 + $0x3c] ss:$28 sps:$4 sm:$0xff]  }
 0x215   :  { %2594 = vmatpush1.bf16.msra.mxu1 %v5544_v15  ;;  %v5598_v15 = vld [vmem:[#allocation13 + $0x3f0] ss:$28 sps:$4 sm:$0xff]  }
 0x216   :  { %2595 = vmatprep.subr.bf16.mxu1 %v5552_v19  ;;  %v5601_v19 = vld [vmem:[#allocation13 + $0x38] ss:$28 sps:$4 sm:$0xff]  }
 0x219   :  { %2596 = vmatpush1.bf16.msra.mxu1 %v5550_v22  ;;  %v5609_v22 = vld [vmem:[#allocation13 + $0x4] ss:$28 sps:$4 sm:$0xff]  }
 0x21a   :  { %2597 = vmatprep.subr.bf16.mxu1 %v5558_v26  ;;  %v5607_v26 = vld [vmem:[#allocation13] ss:$28 sps:$4 sm:$0xff]  }
 0x21d   :  { %2598 = vmatpush1.bf16.msra.mxu1 %v5556_v30  ;;  %v5615_v30 = vld [vmem:[#allocation13 + $0x34c] ss:$28 sps:$4 sm:$0xff]  }
 0x21e   :  { %2599 = vmatprep.subr.bf16.mxu1 %v5564_v24  ;;  %v5613_v24 = vld [vmem:[#allocation13 + $0x348] ss:$28 sps:$4 sm:$0xff]  }
 0x221   :  { %2600 = vmatpush1.bf16.msra.mxu1 %v5562_v27  ;;  %v5621_v27 = vld [vmem:[#allocation13 + $0x314] ss:$28 sps:$4 sm:$0xff]  }
 0x222   :  { %4120 = vmatprep.subr.bf16.mxu1 %v5570_v28  ;;  %v5619_v28 = vld [vmem:[#allocation13 + $0x310] ss:$28 sps:$4 sm:$0xff]  }
 0x263   :  { %v2275_v33 = vpop.f32.mrf.mxu0 }
 0x264   :  { %v2276_v41 = vadd.f32 %v2275_v33, %v1914_v52  ;;  %v5622_v33 = vld [vmem:[#allocation13 + $0x690] ss:$28 sps:$4 sm:$0xff]   ;;  %v5633_v52 = vld [vmem:[#allocation13 + $0x2a4] ss:$28 sps:$4 sm:$0xff]  }
 0x265   :  { %v2277_v34 = vpop.f32.mrf.mxu0 }
 0x266   :  { %v2278_v43 = vadd.f32 %v2277_v34, %v1918_v40  ;;  %v5627_v34 = vld [vmem:[#allocation13 + $0x2dc] ss:$28 sps:$4 sm:$0xff]   ;;  %v5636_v40 = vld [vmem:[#allocation13 + $0x624] ss:$28 sps:$4 sm:$0xff]  }
 0x267   :  { %v2279_v35 = vpop.f32.mrf.mxu0 }
 0x268   :  { %v5630_v35 = vld [vmem:[#allocation13 + $0x65c] ss:$28 sps:$4 sm:$0xff]  }
 0x269   :  { %v2280_v36 = vpop.f32.mrf.mxu0 }
 0x26a   :  { %v5625_v36 = vld [vmem:[#allocation13 + $0x2d8] ss:$28 sps:$4 sm:$0xff]  }
 0x2c4   :  { %v2316_v42 = vpop.f32.mrf.mxu1 }
 0x2c5   :  { %v2317_v44 = vadd.f32 %v2316_v42, %v2276_v41  ;;  %v5631_v41 = vld [vmem:[#allocation13 + $0x2a0] ss:$28 sps:$4 sm:$0xff]  }
 0x2c6   :  { %v2318_v45 = vpop.f32.mrf.mxu1  ;;  %v5634_v42 = vld [vmem:[#allocation13 + $0x620] ss:$28 sps:$4 sm:$0xff]  }
 0x2c7   :  { %4447 = vst [vmem:[#allocation15] sm:$0xff] %v2317_v44  ;;  %v2319_v46 = vadd.f32 %v2318_v45, %v2278_v43  ;;  %v5639_v43 = vld [vmem:[#allocation13 + $0x26c] ss:$28 sps:$4 sm:$0xff]  }
 0x2c8   :  { %v2320_v48 = vpop.f32.mrf.mxu1  ;;  %v5637_v45 = vld [vmem:[#allocation13 + $0x268] ss:$28 sps:$4 sm:$0xff]  }
 0x2c9   :  { %v2324_v50 = vmul.f32 0.5, %v2319_v46  ;;  %4448 = vst [vmem:[#allocation15 + $0x8] sm:$0xff] %v2319_v46  ;;  %v5640_v46 = vld [vmem:[#allocation13 + $0x5e8] ss:$28 sps:$4 sm:$0xff]   ;;  %v5645_v48 = vld [vmem:[#allocation13 + $0x234] ss:$28 sps:$4 sm:$0xff]  }
 0x2ca   :  { %v2321_v51 = vpop.f32.mrf.mxu1 }
 0x2cb   :  { %v2325_v53 = vmul.f32 1.442695, %v2324_v50  ;;  %v5648_v50 = vld [vmem:[#allocation13 + $0x5b4] ss:$28 sps:$4 sm:$0xff]  }
 0x2cc   :  { %v5643_v51 = vld [vmem:[#allocation13 + $0x230] ss:$28 sps:$4 sm:$0xff]  }
 0x2cd   :  { %5885 = vpow2.f32 %v2325_v53  ;;  %v5646_v53 = vld [vmem:[#allocation13 + $0x5b0] ss:$28 sps:$4 sm:$0xff]  }
 0x2da   :  { %v5886_v55 = vpop.eup %5885 }
 0x2db   :  { %v2327_v56 = vmul.f32 %v5886_v55, %v2323_v54  ;;  %v5651_v54 = vld [vmem:[#allocation13 + $0x1fc] ss:$28 sps:$4 sm:$0xff]  }
 0x2dc   :  { %v5654_v55 = vld [vmem:[#allocation13 + $0x57c] ss:$28 sps:$4 sm:$0xff]  }
 0x2dd   :  { %v2328_v57 = vadd.f32 %v2327_v56, %v2317_v44  ;;  %v5642_v44 = vld [vmem:[#allocation13 + $0x5ec] ss:$28 sps:$4 sm:$0xff]   ;;  %v5649_v56 = vld [vmem:[#allocation13 + $0x1f8] ss:$28 sps:$4 sm:$0xff]  }
 0x2df   :  { %v2329_v60 = vpack.c.bf16 %v2328_v57, %v2328_v57  ;;  %v5652_v57 = vld [vmem:[#allocation13 + $0x578] ss:$28 sps:$4 sm:$0xff]  }
 0x2e1   :  { %2577 = vmatmul.mubr.bf16.vlgmr.msra.gmra.mxu0 %v2329_v60  ;;  %2618 = vmatmul.mubr.bf16.vlgmr.msra.gmra.mxu1 %v2329_v60  ;;  %v5655_v60 = vld [vmem:[#allocation13 + $0x1c0] ss:$28 sps:$4 sm:$0xff]  }
 0x2e2   :  { %4080 = vmatpush1.bf16.msra.mxu0 %v5565_v58  ;;  %4121 = vmatpush1.bf16.msra.mxu1 %v5568_v59  ;;  %v5657_v58 = vld [vmem:[#allocation13 + $0x1c4] ss:$28 sps:$4 sm:$0xff]  }
 0x2e3   :  { %4081 = vmatprep.subr.bf16.mxu0 %v5573_v61  ;;  %4122 = vmatprep.subr.bf16.mxu1 %v5576_v62  ;;  %v5660_v59 = vld [vmem:[#allocation13 + $0x544] ss:$28 sps:$4 sm:$0xff]   ;;  %v5663_v62 = vld [vmem:[#allocation13 + $0x194] ss:$28 sps:$4 sm:$0xff]  }
 0x2e4   :  { %v5658_v61 = vld [vmem:[#allocation13 + $0x540] ss:$28 sps:$4 sm:$0xff]  }
 0x2e6   :  { %4082 = vmatpush1.bf16.msra.mxu0 %v5571_v63  ;;  %4123 = vmatpush1.bf16.msra.mxu1 %v5574_v0  ;;  %v5666_v63 = vld [vmem:[#allocation13 + $0x514] ss:$28 sps:$4 sm:$0xff]   ;;  %v2362_v0 = vld [vmem:[#allocation11] sm:$0xf] }
 0x2e7   :  { %4083 = vmatprep.subr.bf16.mxu0 %v5579_v1  ;;  %4124 = vmatprep.subr.bf16.mxu1 %v5582_v49  ;;  %v2367_v1 = vrot.slane %v2362_v0, %v6245_v20  ;;  %v2375_v49 = vrot.slane %v2362_v0, %v6261_v38 }
 0x2ea   :  { %4084 = vmatpush1.bf16.msra.mxu0 %v5577_v2  ;;  %4125 = vmatpush1.bf16.msra.mxu1 %v5580_v3  ;;  %v2371_v2 = vrot.slane %v2362_v0, %v6251_v6  ;;  %v2379_v3 = vrot.slane %v2362_v0, %v6264_v9  ;;  %v5717_v0 = vld [vmem:[#allocation13 + $0x31c] ss:$28 sps:$4 sm:$0xff]  }
 0x2eb   :  { %4085 = vmatprep.subr.bf16.mxu0 %v5585_v8  ;;  %4126 = vmatprep.subr.bf16.mxu1 %v5588_v4 }
 0x2ee   :  { %4086 = vmatpush1.bf16.msra.mxu0 %v5583_v5  ;;  %4127 = vmatpush1.bf16.msra.mxu1 %v5586_v7 }
 0x2ef   :  { %4087 = vmatprep.subr.bf16.mxu0 %v5591_v10  ;;  %4128 = vmatprep.subr.bf16.mxu1 %v5594_v11 }
 0x2f2   :  { %4088 = vmatpush1.bf16.msra.mxu0 %v5589_v39  ;;  %4129 = vmatpush1.bf16.msra.mxu1 %v5592_v12 }
 0x2f3   :  { %4089 = vmatprep.subr.bf16.mxu0 %v5597_v18  ;;  %4130 = vmatprep.subr.bf16.mxu1 %v5600_v13 }
 0x2f6   :  { %4090 = vmatpush1.bf16.msra.mxu0 %v5595_v14  ;;  %4131 = vmatpush1.bf16.msra.mxu1 %v5598_v15 }
 0x2f7   :  { %4091 = vmatprep.subr.bf16.mxu0 %v5603_v16  ;;  %4132 = vmatprep.subr.bf16.mxu1 %v5606_v17 }
 0x2fa   :  { %4092 = vmatpush1.bf16.msra.mxu0 %v5601_v19  ;;  %4133 = vmatpush1.bf16.msra.mxu1 %v5604_v21 }
 0x2fb   :  { %4093 = vmatprep.subr.bf16.mxu0 %v5609_v22  ;;  %4134 = vmatprep.subr.bf16.mxu1 %v5612_v23 }
 0x2fe   :  { %4094 = vmatpush1.bf16.msra.mxu0 %v5607_v26  ;;  %4135 = vmatpush1.bf16.msra.mxu1 %v5610_v29  ;;  %v5661_v26 = vld [vmem:[#allocation13 + $0x190] ss:$28 sps:$4 sm:$0xff]  }
 0x2ff   :  { %4095 = vmatprep.subr.bf16.mxu0 %v5615_v30  ;;  %4136 = vmatprep.subr.bf16.mxu1 %v5618_v31  ;;  %v5664_v29 = vld [vmem:[#allocation13 + $0x510] ss:$28 sps:$4 sm:$0xff]  }
 0x302   :  { %4096 = vmatpush2.bf16.msra.mxu0 %v5613_v24  ;;  %4137 = vmatpush2.bf16.msra.mxu1 %v5616_v25  ;;  %v5669_v24 = vld [vmem:[#allocation13 + $0x15c] ss:$28 sps:$4 sm:$0xff]  }
 0x303   :  { %4097 = vmatprep.subr.bf16.mxu0 %v5621_v27  ;;  %4138 = vmatprep.subr.bf16.mxu1 %v5624_v32  ;;  %v5672_v25 = vld [vmem:[#allocation13 + $0x4dc] ss:$28 sps:$4 sm:$0xff]  }
 0x304   :  { %v5667_v27 = vld [vmem:[#allocation13 + $0x158] ss:$28 sps:$4 sm:$0xff]  }
 0x305   :  { %v5670_v32 = vld [vmem:[#allocation13 + $0x4d8] ss:$28 sps:$4 sm:$0xff]  }
 0x306   :  { %4098 = vmatpush2.bf16.msra.mxu0 %v5619_v28  ;;  %4139 = vmatpush2.bf16.msra.mxu1 %v5622_v33  ;;  %v5675_v28 = vld [vmem:[#allocation13 + $0x124] ss:$28 sps:$4 sm:$0xff]  }
 0x307   :  { %4099 = vmatprep.subr.bf16.mxu0 %v5627_v34  ;;  %4140 = vmatprep.subr.bf16.mxu1 %v5630_v35  ;;  %v5678_v33 = vld [vmem:[#allocation13 + $0x4a4] ss:$28 sps:$4 sm:$0xff]  }
 0x308   :  { %v5673_v34 = vld [vmem:[#allocation13 + $0x120] ss:$28 sps:$4 sm:$0xff]  }
 0x309   :  { %v5676_v35 = vld [vmem:[#allocation13 + $0x4a0] ss:$28 sps:$4 sm:$0xff]  }
 0x30a   :  { %4100 = vmatpush2.bf16.msra.mxu0 %v5625_v36  ;;  %4141 = vmatpush2.bf16.msra.mxu1 %v5628_v37  ;;  %v5681_v36 = vld [vmem:[#allocation13 + $0xec] ss:$28 sps:$4 sm:$0xff]  }
 0x30b   :  { %4101 = vmatprep.subr.bf16.mxu0 %v5633_v52  ;;  %4142 = vmatprep.subr.bf16.mxu1 %v5636_v40  ;;  %v5684_v37 = vld [vmem:[#allocation13 + $0x46c] ss:$28 sps:$4 sm:$0xff]  }
 0x30c   :  { %v5679_v52 = vld [vmem:[#allocation13 + $0xe8] ss:$28 sps:$4 sm:$0xff]  }
 0x30d   :  { %v5682_v40 = vld [vmem:[#allocation13 + $0x468] ss:$28 sps:$4 sm:$0xff]  }
 0x30e   :  { %4102 = vmatpush2.bf16.msra.mxu0 %v5631_v41  ;;  %4143 = vmatpush2.bf16.msra.mxu1 %v5634_v42  ;;  %v5687_v41 = vld [vmem:[#allocation13 + $0xb4] ss:$28 sps:$4 sm:$0xff]  }
 0x30f   :  { %4103 = vmatprep.subr.bf16.mxu0 %v5639_v43  ;;  %4144 = vmatprep.subr.bf16.mxu1 %v5642_v44  ;;  %v5690_v42 = vld [vmem:[#allocation13 + $0x434] ss:$28 sps:$4 sm:$0xff]  }
 0x310   :  { %v5685_v43 = vld [vmem:[#allocation13 + $0xb0] ss:$28 sps:$4 sm:$0xff]  }
 0x311   :  { %v5688_v44 = vld [vmem:[#allocation13 + $0x430] ss:$28 sps:$4 sm:$0xff]  }
 0x312   :  { %4104 = vmatpush2.bf16.msra.mxu0 %v5637_v45  ;;  %4145 = vmatpush2.bf16.msra.mxu1 %v5640_v46  ;;  %v5693_v45 = vld [vmem:[#allocation13 + $0x7c] ss:$28 sps:$4 sm:$0xff]  }
 0x313   :  { %4105 = vmatprep.subr.bf16.mxu0 %v5645_v48  ;;  %4146 = vmatprep.subr.bf16.mxu1 %v5648_v50  ;;  %v5696_v46 = vld [vmem:[#allocation13 + $0x3fc] ss:$28 sps:$4 sm:$0xff]  }
 0x314   :  { %v5691_v48 = vld [vmem:[#allocation13 + $0x78] ss:$28 sps:$4 sm:$0xff]  }
 0x315   :  { %v5694_v50 = vld [vmem:[#allocation13 + $0x3f8] ss:$28 sps:$4 sm:$0xff]  }
 0x316   :  { %4106 = vmatpush2.bf16.msra.mxu0 %v5643_v51  ;;  %4147 = vmatpush2.bf16.msra.mxu1 %v5646_v53  ;;  %v5699_v51 = vld [vmem:[#allocation13 + $0x44] ss:$28 sps:$4 sm:$0xff]  }
 0x317   :  { %4107 = vmatprep.subr.bf16.mxu0 %v5651_v54  ;;  %4148 = vmatprep.subr.bf16.mxu1 %v5654_v55  ;;  %v5702_v53 = vld [vmem:[#allocation13 + $0x3c4] ss:$28 sps:$4 sm:$0xff]  }
 0x318   :  { %v5697_v54 = vld [vmem:[#allocation13 + $0x40] ss:$28 sps:$4 sm:$0xff]  }
 0x319   :  { %v5700_v55 = vld [vmem:[#allocation13 + $0x3c0] ss:$28 sps:$4 sm:$0xff]  }
 0x31a   :  { %4108 = vmatpush2.bf16.msra.mxu0 %v5649_v56  ;;  %4149 = vmatpush2.bf16.msra.mxu1 %v5652_v57  ;;  %v5705_v56 = vld [vmem:[#allocation13 + $0xc] ss:$28 sps:$4 sm:$0xff]  }
 0x31b   :  { %4109 = vmatprep.subr.bf16.mxu0 %v5657_v58  ;;  %4150 = vmatprep.subr.bf16.mxu1 %v5660_v59  ;;  %v5708_v57 = vld [vmem:[#allocation13 + $0x38c] ss:$28 sps:$4 sm:$0xff]  }
 0x31c   :  { %v5703_v58 = vld [vmem:[#allocation13 + $0x8] ss:$28 sps:$4 sm:$0xff]  }
 0x31d   :  { %v5706_v59 = vld [vmem:[#allocation13 + $0x388] ss:$28 sps:$4 sm:$0xff]  }
 0x31e   :  { %4110 = vmatpush2.bf16.msra.mxu0 %v5655_v60  ;;  %4151 = vmatpush2.bf16.msra.mxu1 %v5658_v61  ;;  %v5711_v60 = vld [vmem:[#allocation13 + $0x354] ss:$28 sps:$4 sm:$0xff]  }
 0x31f   :  { %4161 = vmatprep.subr.bf16.mxu0 %v5663_v62  ;;  %4202 = vmatprep.subr.bf16.mxu1 %v5666_v63  ;;  %v5714_v61 = vld [vmem:[#allocation13 + $0x6d4] ss:$28 sps:$4 sm:$0xff]  }
 0x320   :  { %v5709_v62 = vld [vmem:[#allocation13 + $0x350] ss:$28 sps:$4 sm:$0xff]  }
 0x321   :  { %v5712_v63 = vld [vmem:[#allocation13 + $0x6d0] ss:$28 sps:$4 sm:$0xff]  }
 0x3a1   :  { %v2578_v8 = vpop.f32.mrf.mxu0  ;;  %v2619_v4 = vpop.f32.mrf.mxu1 }
 0x3a2   :  { %v2579_v5 = vadd.f32 %v2578_v8, %v2367_v1  ;;  %v2620_v7 = vadd.f32 %v2619_v4, %v2375_v49  ;;  %v5720_v1 = vld [vmem:[#allocation13 + $0x69c] ss:$28 sps:$4 sm:$0xff]   ;;  %v5726_v8 = vld [vmem:[#allocation13 + $0x664] ss:$28 sps:$4 sm:$0xff]  }
 0x3a3   :  { %v2580_v10 = vpop.f32.mrf.mxu0  ;;  %v2621_v11 = vpop.f32.mrf.mxu1  ;;  %v5715_v49 = vld [vmem:[#allocation13 + $0x318] ss:$28 sps:$4 sm:$0xff]   ;;  %v5721_v4 = vld [vmem:[#allocation13 + $0x2e0] ss:$28 sps:$4 sm:$0xff]  }
 0x3a4   :  { %v2581_v39 = vadd.f32 %v2580_v10, %v2371_v2  ;;  %v2622_v12 = vadd.f32 %v2621_v11, %v2379_v3  ;;  %v2626_v18 = vmax.f32 %v2579_v5, 0.0  ;;  %v2628_v13 = vmax.f32 %v2620_v7, 0.0  ;;  %v5718_v2 = vld [vmem:[#allocation13 + $0x698] ss:$28 sps:$4 sm:$0xff]   ;;  %v5723_v3 = vld [vmem:[#allocation13 + $0x2e4] ss:$28 sps:$4 sm:$0xff]  }
 0x3a5   :  { %v2582_v14 = vpop.f32.mrf.mxu0  ;;  %v2623_v15 = vpop.f32.mrf.mxu1  ;;  %v5724_v5 = vld [vmem:[#allocation13 + $0x660] ss:$28 sps:$4 sm:$0xff]   ;;  %v5729_v7 = vld [vmem:[#allocation13 + $0x2ac] ss:$28 sps:$4 sm:$0xff]  }
 0x3a6   :  { %v2627_v16 = vmax.f32 %v2581_v39, 0.0  ;;  %v2629_v17 = vmax.f32 %v2622_v12, 0.0  ;;  %v6282_v30 = vpack.c.bf16 %v2626_v18, %v2626_v18  ;;  %v6284_v31 = vpack.c.bf16 %v2628_v13, %v2628_v13  ;;  %v5732_v10 = vld [vmem:[#allocation13 + $0x62c] ss:$28 sps:$4 sm:$0xff]   ;;  %v5735_v12 = vld [vmem:[#allocation13 + $0x274] ss:$28 sps:$4 sm:$0xff]  }
 0x3a7   :  { %v2583_v19 = vpop.f32.mrf.mxu0  ;;  %v2624_v21 = vpop.f32.mrf.mxu1  ;;  %v5727_v11 = vld [vmem:[#allocation13 + $0x2a8] ss:$28 sps:$4 sm:$0xff]   ;;  %v5738_v18 = vld [vmem:[#allocation13 + $0x5f4] ss:$28 sps:$4 sm:$0xff]   ;;  %v5741_v15 = vld [vmem:[#allocation13 + $0x23c] ss:$28 sps:$4 sm:$0xff]  }
 0x3a8   :  { %v6278_v22 = vpack.c.bf16 %v2627_v16, %v2627_v16  ;;  %v6280_v23 = vpack.c.bf16 %v2629_v17, %v2629_v17  ;;  %v5730_v39 = vld [vmem:[#allocation13 + $0x628] ss:$28 sps:$4 sm:$0xff]   ;;  %v5733_v13 = vld [vmem:[#allocation13 + $0x270] ss:$28 sps:$4 sm:$0xff]   ;;  %v5744_v16 = vld [vmem:[#allocation13 + $0x5bc] ss:$28 sps:$4 sm:$0xff]  }
 0x3a9   :  { %v5736_v14 = vld [vmem:[#allocation13 + $0x5f0] ss:$28 sps:$4 sm:$0xff]   ;;  %v5739_v17 = vld [vmem:[#allocation13 + $0x238] ss:$28 sps:$4 sm:$0xff]   ;;  %v5747_v21 = vld [vmem:[#allocation13 + $0x204] ss:$28 sps:$4 sm:$0xff]  }
 0x3aa   :  { %4111 = vmatprep.mubr.bf16.mxu0 %v6278_v22  ;;  %4152 = vmatprep.mubr.bf16.mxu1 %v6280_v23  ;;  %v5742_v19 = vld [vmem:[#allocation13 + $0x5b8] ss:$28 sps:$4 sm:$0xff]  }
 0x3ab   :  { %4112 = vmatmul.mubr.bf16.vlgmr.msra.gmra.mxu0 %v6282_v30  ;;  %4153 = vmatmul.mubr.bf16.vlgmr.msra.gmra.mxu1 %v6284_v31 }
 0x3ac   :  { %4162 = vmatpush1.bf16.msra.mxu0 %v5661_v26  ;;  %4203 = vmatpush1.bf16.msra.mxu1 %v5664_v29  ;;  %v5750_v26 = vld [vmem:[#allocation13 + $0x584] ss:$28 sps:$4 sm:$0xff]  }
 0x3ad   :  { %4193 = vmatprep.mubr.bf16.mxu0 %v6278_v22  ;;  %4234 = vmatprep.mubr.bf16.mxu1 %v6280_v23  ;;  %v5745_v29 = vld [vmem:[#allocation13 + $0x200] ss:$28 sps:$4 sm:$0xff]  }
 0x3ae   :  { %4163 = vmatprep.subr.bf16.mxu0 %v5669_v24  ;;  %4204 = vmatprep.subr.bf16.mxu1 %v5672_v25  ;;  %v5748_v24 = vld [vmem:[#allocation13 + $0x580] ss:$28 sps:$4 sm:$0xff]   ;;  %v5753_v25 = vld [vmem:[#allocation13 + $0x1cc] ss:$28 sps:$4 sm:$0xff]  }
 0x3b0   :  { %4164 = vmatpush1.bf16.msra.mxu0 %v5667_v27  ;;  %4205 = vmatpush1.bf16.msra.mxu1 %v5670_v32  ;;  %v5756_v27 = vld [vmem:[#allocation13 + $0x54c] ss:$28 sps:$4 sm:$0xff]  }
 0x3b1   :  { %4165 = vmatprep.subr.bf16.mxu0 %v5675_v28  ;;  %4206 = vmatprep.subr.bf16.mxu1 %v5678_v33  ;;  %v5751_v32 = vld [vmem:[#allocation13 + $0x1c8] ss:$28 sps:$4 sm:$0xff]   ;;  %v5759_v33 = vld [vmem:[#allocation13 + $0x19c] ss:$28 sps:$4 sm:$0xff]  }
 0x3b2   :  { %v5754_v28 = vld [vmem:[#allocation13 + $0x548] ss:$28 sps:$4 sm:$0xff]  }
 0x3b4   :  { %4166 = vmatpush1.bf16.msra.mxu0 %v5673_v34  ;;  %4207 = vmatpush1.bf16.msra.mxu1 %v5676_v35  ;;  %v5762_v34 = vld [vmem:[#allocation13 + $0x51c] ss:$28 sps:$4 sm:$0xff]  }
 0x3b5   :  { %4167 = vmatprep.subr.bf16.mxu0 %v5681_v36  ;;  %4208 = vmatprep.subr.bf16.mxu1 %v5684_v37  ;;  %v5757_v35 = vld [vmem:[#allocation13 + $0x198] ss:$28 sps:$4 sm:$0xff]   ;;  %v5765_v37 = vld [vmem:[#allocation13 + $0x164] ss:$28 sps:$4 sm:$0xff]  }
 0x3b6   :  { %v5760_v36 = vld [vmem:[#allocation13 + $0x518] ss:$28 sps:$4 sm:$0xff]  }
 0x3b8   :  { %4168 = vmatpush1.bf16.msra.mxu0 %v5679_v52  ;;  %4209 = vmatpush1.bf16.msra.mxu1 %v5682_v40  ;;  %v5768_v52 = vld [vmem:[#allocation13 + $0x4e4] ss:$28 sps:$4 sm:$0xff]  }
 0x3b9   :  { %4169 = vmatprep.subr.bf16.mxu0 %v5687_v41  ;;  %4210 = vmatprep.subr.bf16.mxu1 %v5690_v42  ;;  %v5763_v40 = vld [vmem:[#allocation13 + $0x160] ss:$28 sps:$4 sm:$0xff]   ;;  %v5771_v42 = vld [vmem:[#allocation13 + $0x12c] ss:$28 sps:$4 sm:$0xff]  }
 0x3ba   :  { %v5766_v41 = vld [vmem:[#allocation13 + $0x4e0] ss:$28 sps:$4 sm:$0xff]  }
 0x3bc   :  { %4170 = vmatpush1.bf16.msra.mxu0 %v5685_v43  ;;  %4211 = vmatpush1.bf16.msra.mxu1 %v5688_v44  ;;  %v5774_v43 = vld [vmem:[#allocation13 + $0x4ac] ss:$28 sps:$4 sm:$0xff]  }
 0x3bd   :  { %4171 = vmatprep.subr.bf16.mxu0 %v5693_v45  ;;  %4212 = vmatprep.subr.bf16.mxu1 %v5696_v46  ;;  %v5769_v44 = vld [vmem:[#allocation13 + $0x128] ss:$28 sps:$4 sm:$0xff]   ;;  %v5777_v46 = vld [vmem:[#allocation13 + $0xf4] ss:$28 sps:$4 sm:$0xff]  }
 0x3be   :  { %v5772_v45 = vld [vmem:[#allocation13 + $0x4a8] ss:$28 sps:$4 sm:$0xff]  }
 0x3c0   :  { %4172 = vmatpush1.bf16.msra.mxu0 %v5691_v48  ;;  %4213 = vmatpush1.bf16.msra.mxu1 %v5694_v50  ;;  %v5780_v48 = vld [vmem:[#allocation13 + $0x474] ss:$28 sps:$4 sm:$0xff]  }
 0x3c1   :  { %4173 = vmatprep.subr.bf16.mxu0 %v5699_v51  ;;  %4214 = vmatprep.subr.bf16.mxu1 %v5702_v53  ;;  %v5775_v50 = vld [vmem:[#allocation13 + $0xf0] ss:$28 sps:$4 sm:$0xff]   ;;  %v5783_v53 = vld [vmem:[#allocation13 + $0xbc] ss:$28 sps:$4 sm:$0xff]  }
 0x3c2   :  { %v5778_v51 = vld [vmem:[#allocation13 + $0x470] ss:$28 sps:$4 sm:$0xff]  }
 0x3c4   :  { %4174 = vmatpush1.bf16.msra.mxu0 %v5697_v54  ;;  %4215 = vmatpush1.bf16.msra.mxu1 %v5700_v55  ;;  %v5786_v54 = vld [vmem:[#allocation13 + $0x43c] ss:$28 sps:$4 sm:$0xff]  }
 0x3c5   :  { %4175 = vmatprep.subr.bf16.mxu0 %v5705_v56  ;;  %4216 = vmatprep.subr.bf16.mxu1 %v5708_v57  ;;  %v5781_v55 = vld [vmem:[#allocation13 + $0xb8] ss:$28 sps:$4 sm:$0xff]   ;;  %v5789_v57 = vld [vmem:[#allocation13 + $0x84] ss:$28 sps:$4 sm:$0xff]  }
 0x3c6   :  { %v5784_v56 = vld [vmem:[#allocation13 + $0x438] ss:$28 sps:$4 sm:$0xff]  }
 0x3c8   :  { %4176 = vmatpush1.bf16.msra.mxu0 %v5703_v58  ;;  %4217 = vmatpush1.bf16.msra.mxu1 %v5706_v59  ;;  %v5792_v58 = vld [vmem:[#allocation13 + $0x404] ss:$28 sps:$4 sm:$0xff]  }
 0x3c9   :  { %4177 = vmatprep.subr.bf16.mxu0 %v5711_v60  ;;  %4218 = vmatprep.subr.bf16.mxu1 %v5714_v61  ;;  %v5787_v59 = vld [vmem:[#allocation13 + $0x80] ss:$28 sps:$4 sm:$0xff]   ;;  %v5795_v61 = vld [vmem:[#allocation13 + $0x4c] ss:$28 sps:$4 sm:$0xff]  }
 0x3ca   :  { %v5790_v60 = vld [vmem:[#allocation13 + $0x400] ss:$28 sps:$4 sm:$0xff]  }
 0x3cc   :  { %4178 = vmatpush2.bf16.msra.mxu0 %v5709_v62  ;;  %4219 = vmatpush2.bf16.msra.mxu1 %v5712_v63  ;;  %v5798_v62 = vld [vmem:[#allocation13 + $0x3cc] ss:$28 sps:$4 sm:$0xff]  }
 0x3cd   :  { %4179 = vmatprep.subr.bf16.mxu0 %v5717_v0  ;;  %4220 = vmatprep.subr.bf16.mxu1 %v5720_v1  ;;  %v5793_v63 = vld [vmem:[#allocation13 + $0x48] ss:$28 sps:$4 sm:$0xff]   ;;  %v5801_v1 = vld [vmem:[#allocation13 + $0x14] ss:$28 sps:$4 sm:$0xff]  }
 0x3ce   :  { %v5796_v0 = vld [vmem:[#allocation13 + $0x3c8] ss:$28 sps:$4 sm:$0xff]  }
 0x3d0   :  { %4180 = vmatpush2.bf16.msra.mxu0 %v5715_v49  ;;  %4221 = vmatpush2.bf16.msra.mxu1 %v5718_v2  ;;  %v5804_v49 = vld [vmem:[#allocation13 + $0x394] ss:$28 sps:$4 sm:$0xff]  }
 0x3d1   :  { %4181 = vmatprep.subr.bf16.mxu0 %v5723_v3  ;;  %4222 = vmatprep.subr.bf16.mxu1 %v5726_v8  ;;  %v5799_v2 = vld [vmem:[#allocation13 + $0x10] ss:$28 sps:$4 sm:$0xff]   ;;  %v5807_v8 = vld [vmem:[#allocation13 + $0x35c] ss:$28 sps:$4 sm:$0xff]  }
 0x3d2   :  { %v5802_v3 = vld [vmem:[#allocation13 + $0x390] ss:$28 sps:$4 sm:$0xff]  }
 0x3d4   :  { %4182 = vmatpush2.bf16.msra.mxu0 %v5721_v4  ;;  %4223 = vmatpush2.bf16.msra.mxu1 %v5724_v5  ;;  %v5810_v4 = vld [vmem:[#allocation13 + $0x6dc] ss:$28 sps:$4 sm:$0xff]  }
 0x3d5   :  { %4183 = vmatprep.subr.bf16.mxu0 %v5729_v7  ;;  %4224 = vmatprep.subr.bf16.mxu1 %v5732_v10  ;;  %v5805_v5 = vld [vmem:[#allocation13 + $0x358] ss:$28 sps:$4 sm:$0xff]   ;;  %v5813_v10 = vld [vmem:[#allocation13 + $0x324] ss:$28 sps:$4 sm:$0xff]  }
 0x3d6   :  { %v5808_v7 = vld [vmem:[#allocation13 + $0x6d8] ss:$28 sps:$4 sm:$0xff]  }
 0x3d8   :  { %4184 = vmatpush2.bf16.msra.mxu0 %v5727_v11  ;;  %4225 = vmatpush2.bf16.msra.mxu1 %v5730_v39  ;;  %v5816_v11 = vld [vmem:[#allocation13 + $0x6a4] ss:$28 sps:$4 sm:$0xff]  }
 0x3d9   :  { %4185 = vmatprep.subr.bf16.mxu0 %v5735_v12  ;;  %4226 = vmatprep.subr.bf16.mxu1 %v5738_v18  ;;  %v5811_v39 = vld [vmem:[#allocation13 + $0x320] ss:$28 sps:$4 sm:$0xff]   ;;  %v5819_v18 = vld [vmem:[#allocation13 + $0x2ec] ss:$28 sps:$4 sm:$0xff]  }
 0x3da   :  { %v5814_v12 = vld [vmem:[#allocation13 + $0x6a0] ss:$28 sps:$4 sm:$0xff]  }
 0x3dc   :  { %4186 = vmatpush2.bf16.msra.mxu0 %v5733_v13  ;;  %4227 = vmatpush2.bf16.msra.mxu1 %v5736_v14  ;;  %v5822_v13 = vld [vmem:[#allocation13 + $0x66c] ss:$28 sps:$4 sm:$0xff]  }
 0x3dd   :  { %4187 = vmatprep.subr.bf16.mxu0 %v5741_v15  ;;  %4228 = vmatprep.subr.bf16.mxu1 %v5744_v16  ;;  %v5817_v14 = vld [vmem:[#allocation13 + $0x2e8] ss:$28 sps:$4 sm:$0xff]   ;;  %v5825_v16 = vld [vmem:[#allocation13 + $0x2b4] ss:$28 sps:$4 sm:$0xff]  }
 0x3de   :  { %v5820_v15 = vld [vmem:[#allocation13 + $0x668] ss:$28 sps:$4 sm:$0xff]  }
 0x3e0   :  { %4188 = vmatpush2.bf16.msra.mxu0 %v5739_v17  ;;  %4229 = vmatpush2.bf16.msra.mxu1 %v5742_v19  ;;  %v5828_v17 = vld [vmem:[#allocation13 + $0x634] ss:$28 sps:$4 sm:$0xff]  }
 0x3e1   :  { %4189 = vmatprep.subr.bf16.mxu0 %v5747_v21  ;;  %4230 = vmatprep.subr.bf16.mxu1 %v5750_v26  ;;  %v5823_v19 = vld [vmem:[#allocation13 + $0x2b0] ss:$28 sps:$4 sm:$0xff]   ;;  %v5831_v26 = vld [vmem:[#allocation13 + $0x27c] ss:$28 sps:$4 sm:$0xff]  }
 0x3e2   :  { %v5826_v21 = vld [vmem:[#allocation13 + $0x630] ss:$28 sps:$4 sm:$0xff]  }
 0x3e4   :  { %4190 = vmatpush2.bf16.msra.mxu0 %v5745_v29  ;;  %4231 = vmatpush2.bf16.msra.mxu1 %v5748_v24  ;;  %v5834_v29 = vld [vmem:[#allocation13 + $0x5fc] ss:$28 sps:$4 sm:$0xff]  }
 0x3e5   :  { %4191 = vmatprep.subr.bf16.mxu0 %v5753_v25  ;;  %4232 = vmatprep.subr.bf16.mxu1 %v5756_v27  ;;  %v5829_v24 = vld [vmem:[#allocation13 + $0x278] ss:$28 sps:$4 sm:$0xff]   ;;  %v5837_v27 = vld [vmem:[#allocation13 + $0x244] ss:$28 sps:$4 sm:$0xff]  }
 0x3e6   :  { %v5832_v25 = vld [vmem:[#allocation13 + $0x5f8] ss:$28 sps:$4 sm:$0xff]  }
 0x3e8   :  { %4192 = vmatpush2.bf16.msra.mxu0 %v5751_v32  ;;  %4233 = vmatpush2.bf16.msra.mxu1 %v5754_v28  ;;  %v5840_v32 = vld [vmem:[#allocation13 + $0x5c4] ss:$28 sps:$4 sm:$0xff]  }
 0x3e9   :  { %4243 = vmatprep.subr.bf16.mxu0 %v5759_v33  ;;  %4284 = vmatprep.subr.bf16.mxu1 %v5762_v34  ;;  %v5835_v28 = vld [vmem:[#allocation13 + $0x240] ss:$28 sps:$4 sm:$0xff]   ;;  %v5843_v34 = vld [vmem:[#allocation13 + $0x20c] ss:$28 sps:$4 sm:$0xff]  }
 0x3ea   :  { %v5838_v33 = vld [vmem:[#allocation13 + $0x5c0] ss:$28 sps:$4 sm:$0xff]  }
 0x3eb   :  { %4194 = vmatmul.mubr.bf16.vlgmr.msra.gmra.mxu0 %v6282_v30  ;;  %4235 = vmatmul.mubr.bf16.vlgmr.msra.gmra.mxu1 %v6284_v31 }
 0x3ec   :  { %4244 = vmatpush1.bf16.msra.mxu0 %v5757_v35  ;;  %4275 = vmatprep.mubr.bf16.mxu0 %v6278_v22  ;;  %v5846_v35 = vld [vmem:[#allocation13 + $0x58c] ss:$28 sps:$4 sm:$0xff]  }
 0x3ed   :  { %4285 = vmatpush1.bf16.msra.mxu1 %v5760_v36  ;;  %4316 = vmatprep.mubr.bf16.mxu1 %v6280_v23  ;;  %v5841_v36 = vld [vmem:[#allocation13 + $0x208] ss:$28 sps:$4 sm:$0xff]  }
 0x3ee   :  { %4245 = vmatprep.subr.bf16.mxu0 %v5765_v37  ;;  %4286 = vmatprep.subr.bf16.mxu1 %v5768_v52  ;;  %v5844_v37 = vld [vmem:[#allocation13 + $0x588] ss:$28 sps:$4 sm:$0xff]   ;;  %v5849_v52 = vld [vmem:[#allocation13 + $0x1d4] ss:$28 sps:$4 sm:$0xff]  }
 0x3f0   :  { %4246 = vmatpush1.bf16.msra.mxu0 %v5763_v40  ;;  %v5852_v40 = vld [vmem:[#allocation13 + $0x554] ss:$28 sps:$4 sm:$0xff]  }
 0x3f1   :  { %4287 = vmatpush1.bf16.msra.mxu1 %v5766_v41  ;;  %4247 = vmatprep.subr.bf16.mxu0 %v5771_v42  ;;  %v5847_v41 = vld [vmem:[#allocation13 + $0x1d0] ss:$28 sps:$4 sm:$0xff]  }
 0x3f2   :  { %4288 = vmatprep.subr.bf16.mxu1 %v5774_v43  ;;  %v5850_v42 = vld [vmem:[#allocation13 + $0x550] ss:$28 sps:$4 sm:$0xff]   ;;  %v5853_v43 = vld [vmem:[#allocation13 + $0x360] ss:$28 sps:$4 sm:$0xff]  }
 0x3f4   :  { %4248 = vmatpush1.bf16.msra.mxu0 %v5769_v44  ;;  %v5854_v44 = vld [vmem:[#allocation13 + $0x6e0] ss:$28 sps:$4 sm:$0xff]  }
 0x3f5   :  { %4289 = vmatpush1.bf16.msra.mxu1 %v5772_v45  ;;  %4249 = vmatprep.subr.bf16.mxu0 %v5777_v46  ;;  %v5855_v45 = vld [vmem:[#allocation13 + $0x1a0] ss:$28 sps:$4 sm:$0xff]  }
 0x3f6   :  { %4290 = vmatprep.subr.bf16.mxu1 %v5780_v48  ;;  %v5856_v46 = vld [vmem:[#allocation13 + $0x520] ss:$28 sps:$4 sm:$0xff]   ;;  %v5857_v48 = vld [vmem:[#allocation13 + $0x328] ss:$28 sps:$4 sm:$0xff]  }
 0x3f8   :  { %4250 = vmatpush1.bf16.msra.mxu0 %v5775_v50  ;;  %v5858_v50 = vld [vmem:[#allocation13 + $0x6a8] ss:$28 sps:$4 sm:$0xff]  }
 0x3f9   :  { %4291 = vmatpush1.bf16.msra.mxu1 %v5778_v51  ;;  %4251 = vmatprep.subr.bf16.mxu0 %v5783_v53  ;;  %v5859_v51 = vld [vmem:[#allocation13 + $0x168] ss:$28 sps:$4 sm:$0xff]  }
 0x3fa   :  { %4292 = vmatprep.subr.bf16.mxu1 %v5786_v54  ;;  %v5860_v53 = vld [vmem:[#allocation13 + $0x4e8] ss:$28 sps:$4 sm:$0xff]   ;;  %v5861_v54 = vld [vmem:[#allocation13 + $0x2f0] ss:$28 sps:$4 sm:$0xff]  }
 0x3fc   :  { %4252 = vmatpush1.bf16.msra.mxu0 %v5781_v55  ;;  %v5862_v55 = vld [vmem:[#allocation13 + $0x670] ss:$28 sps:$4 sm:$0xff]  }
 0x3fd   :  { %4293 = vmatpush1.bf16.msra.mxu1 %v5784_v56  ;;  %4253 = vmatprep.subr.bf16.mxu0 %v5789_v57  ;;  %v5863_v56 = vld [vmem:[#allocation13 + $0x130] ss:$28 sps:$4 sm:$0xff]  }
 0x3fe   :  { %4294 = vmatprep.subr.bf16.mxu1 %v5792_v58  ;;  %v5864_v57 = vld [vmem:[#allocation13 + $0x4b0] ss:$28 sps:$4 sm:$0xff]   ;;  %v5865_v58 = vld [vmem:[#allocation13 + $0x2b8] ss:$28 sps:$4 sm:$0xff]  }
 0x400   :  { %4254 = vmatpush1.bf16.msra.mxu0 %v5787_v59  ;;  %v5866_v59 = vld [vmem:[#allocation13 + $0x638] ss:$28 sps:$4 sm:$0xff]  }
 0x401   :  { %4295 = vmatpush1.bf16.msra.mxu1 %v5790_v60  ;;  %4255 = vmatprep.subr.bf16.mxu0 %v5795_v61  ;;  %v5867_v60 = vld [vmem:[#allocation13 + $0xf8] ss:$28 sps:$4 sm:$0xff]   ;;  %v5869_v61 = vld [vmem:[#allocation13 + $0x280] ss:$28 sps:$4 sm:$0xff]  }
 0x402   :  { %4296 = vmatprep.subr.bf16.mxu1 %v5798_v62  ;;  %v5870_v62 = vld [vmem:[#allocation13 + $0x600] ss:$28 sps:$4 sm:$0xff]  }
 0x404   :  { %4256 = vmatpush1.bf16.msra.mxu0 %v5793_v63  ;;  %v5872_v63 = vld [vmem:[#allocation13 + $0x440] ss:$28 sps:$4 sm:$0xff]  }
 0x405   :  { %4297 = vmatpush1.bf16.msra.mxu1 %v5796_v0  ;;  %4257 = vmatprep.subr.bf16.mxu0 %v5801_v1  ;;  %v5873_v0 = vld [vmem:[#allocation13 + $0x248] ss:$28 sps:$4 sm:$0xff]  }
 0x406   :  { %4298 = vmatprep.subr.bf16.mxu1 %v5804_v49  ;;  %v5874_v1 = vld [vmem:[#allocation13 + $0x5c8] ss:$28 sps:$4 sm:$0xff]  }
 0x407   :  { %v5875_v49 = vld [vmem:[#allocation13 + $0x88] ss:$28 sps:$4 sm:$0xff]  }
 0x408   :  { %4258 = vmatpush1.bf16.msra.mxu0 %v5799_v2  ;;  %v5876_v2 = vld [vmem:[#allocation13 + $0x408] ss:$28 sps:$4 sm:$0xff]  }
 0x409   :  { %4299 = vmatpush1.bf16.msra.mxu1 %v5802_v3  ;;  %4259 = vmatprep.subr.bf16.mxu0 %v5807_v8  ;;  %v5877_v3 = vld [vmem:[#allocation13 + $0x210] ss:$28 sps:$4 sm:$0xff]  }
 0x40a   :  { %4300 = vmatprep.subr.bf16.mxu1 %v5810_v4  ;;  %v5878_v8 = vld [vmem:[#allocation13 + $0x590] ss:$28 sps:$4 sm:$0xff]  }
 0x40b   :  { %v5879_v4 = vld [vmem:[#allocation13 + $0x50] ss:$28 sps:$4 sm:$0xff]  }
 0x40c   :  { %4260 = vmatpush2.bf16.msra.mxu0 %v5805_v5  ;;  %v5880_v5 = vld [vmem:[#allocation13 + $0x3d0] ss:$28 sps:$4 sm:$0xff]  }
 0x40d   :  { %4301 = vmatpush2.bf16.msra.mxu1 %v5808_v7  ;;  %4261 = vmatprep.subr.bf16.mxu0 %v5813_v10  ;;  %v5881_v7 = vld [vmem:[#allocation13 + $0x1d8] ss:$28 sps:$4 sm:$0xff]  }
 0x40e   :  { %4302 = vmatprep.subr.bf16.mxu1 %v5816_v11  ;;  %v5882_v10 = vld [vmem:[#allocation13 + $0x558] ss:$28 sps:$4 sm:$0xff]  }
 0x40f   :  { %v5883_v11 = vld [vmem:[#allocation13 + $0x18] ss:$28 sps:$4 sm:$0xff]  }
 0x410   :  { %4262 = vmatpush2.bf16.msra.mxu0 %v5811_v39  ;;  %v5884_v39 = vld [vmem:[#allocation13 + $0x398] ss:$28 sps:$4 sm:$0xff]  }
 0x411   :  { %4303 = vmatpush2.bf16.msra.mxu1 %v5814_v12  ;;  %4263 = vmatprep.subr.bf16.mxu0 %v5819_v18  ;;  %v6305_v12 = vld [vmem:[%s6336_s9] sm:$0xff]  ;;  %s6121_s9 = smov [#allocation15]  }
 0x412   :  { %4304 = vmatprep.subr.bf16.mxu1 %v5822_v13  ;;  %v2895_v18 = vrot.slane %v6305_v12, %v6245_v20  ;;  %v2899_v13 = vrot.slane %v6305_v12, %v6251_v6  ;;  %s4465_s16 = sshll.u32 %s6121_s9, 4  ;;  %s4466_s16 = int_to_ptr.vmem [resolvable:$true] %s4465_s16 }
 0x413   :  { %s6055_s4 = scalar_lea.vmem %s4466_s16, 256  ;;  %p6060_p8 = scmp.lt.s32.totalorder %s4466_s16, %s4466_s16 }
 0x414   :  { %4264 = vmatpush2.bf16.msra.mxu0 %v5817_v14  ;;  %p6056_p7 = scmp.ne.s32.totalorder %s4466_s16, %s6055_s4  ;;  %p6061_p9 = scmp.lt.s32.totalorder %s6055_s4, %s6055_s4 }
 0x415   :  { %4305 = vmatpush2.bf16.msra.mxu1 %v5820_v15  ;;  %4265 = vmatprep.subr.bf16.mxu0 %v5825_v16 }
 0x416   :  { %4306 = vmatprep.subr.bf16.mxu1 %v5828_v17  ;;  %p6062_p10 = por %p6061_p9, %p6060_p8 }
 0x418   :  { %4266 = vmatpush2.bf16.msra.mxu0 %v5823_v19  ;;  %p6063_p11 = pnand %p6062_p10, %p6056_p7 }
 0x419   :  { %4307 = vmatpush2.bf16.msra.mxu1 %v5826_v21  ;;  %4267 = vmatprep.subr.bf16.mxu0 %v5831_v26 }
 0x41a   :  { %4308 = vmatprep.subr.bf16.mxu1 %v5834_v29 }
 0x41c   :  { %4268 = vmatpush2.bf16.msra.mxu0 %v5829_v24 }
 0x41d   :  { %4309 = vmatpush2.bf16.msra.mxu1 %v5832_v25  ;;  %4269 = vmatprep.subr.bf16.mxu0 %v5837_v27 }
 0x41e   :  { %4310 = vmatprep.subr.bf16.mxu1 %v5840_v32 }
 0x420   :  { %4270 = vmatpush2.bf16.msra.mxu0 %v5835_v28 }
 0x421   :  { %4311 = vmatpush2.bf16.msra.mxu1 %v5838_v33  ;;  %4271 = vmatprep.subr.bf16.mxu0 %v5843_v34 }
 0x422   :  { %4312 = vmatprep.subr.bf16.mxu1 %v5846_v35 }
 0x424   :  { %4272 = vmatpush2.bf16.msra.mxu0 %v5841_v36 }
 0x425   :  { %4313 = vmatpush2.bf16.msra.mxu1 %v5844_v37  ;;  %4273 = vmatprep.subr.bf16.mxu0 %v5849_v52  ;;  %v2903_v52 = vrot.slane %v6305_v12, %v6261_v38 }
 0x426   :  { %4314 = vmatprep.subr.bf16.mxu1 %v5852_v40  ;;  %v2907_v40 = vrot.slane %v6305_v12, %v6264_v9 }
 0x428   :  { %4274 = vmatpush2.bf16.msra.mxu0 %v5847_v41 }
 0x429   :  { %4315 = vmatpush2.bf16.msra.mxu1 %v5850_v42  ;;  %5025 = vmatprep.subr.bf16.mxu0 %v5853_v43 }
 0x42a   :  { %5047 = vmatprep.subr.bf16.mxu1 %v5854_v44 }
 0x42b   :  { %4276 = vmatmul.mubr.bf16.vlgmr.msra.gmra.mxu0 %v6282_v30 }
 0x42c   :  { %4317 = vmatmul.mubr.bf16.vlgmr.msra.gmra.mxu1 %v6284_v31  ;;  %5026 = vmatpush3.bf16.msra.mxu0 %v5855_v45 }
 0x42d   :  { %4357 = vmatprep.mubr.bf16.mxu0 %v6278_v22  ;;  %5048 = vmatpush3.bf16.msra.mxu1 %v5856_v46  ;;  %v5868_v22 = vld [vmem:[#allocation13 + $0x478] ss:$28 sps:$4 sm:$0xff]  }
 0x42e   :  { %4397 = vmatprep.mubr.bf16.mxu1 %v6280_v23  ;;  %5027 = vmatprep.subr.bf16.mxu0 %v5857_v48  ;;  %v5871_v23 = vld [vmem:[#allocation13 + $0xc0] ss:$28 sps:$4 sm:$0xff]  }
 0x42f   :  { %5049 = vmatprep.subr.bf16.mxu1 %v5858_v50 }
 0x430   :  { %5028 = vmatpush3.bf16.msra.mxu0 %v5859_v51 }
 0x431   :  { %5050 = vmatpush3.bf16.msra.mxu1 %v5860_v53  ;;  %5029 = vmatprep.subr.bf16.mxu0 %v5861_v54 }
 0x432   :  { %5051 = vmatprep.subr.bf16.mxu1 %v5862_v55 }
 0x434   :  { %5030 = vmatpush3.bf16.msra.mxu0 %v5863_v56 }
 0x435   :  { %5052 = vmatpush3.bf16.msra.mxu1 %v5864_v57  ;;  %5031 = vmatprep.subr.bf16.mxu0 %v5865_v58 }
 0x436   :  { %5053 = vmatprep.subr.bf16.mxu1 %v5866_v59 }
 0x438   :  { %5032 = vmatpush3.bf16.msra.mxu0 %v5867_v60 }
 0x439   :  { %5054 = vmatpush3.bf16.msra.mxu1 %v5868_v22  ;;  %5033 = vmatprep.subr.bf16.mxu0 %v5869_v61 }
 0x43a   :  { %5055 = vmatprep.subr.bf16.mxu1 %v5870_v62 }
 0x43c   :  { %5034 = vmatpush3.bf16.msra.mxu0 %v5871_v23 }
 0x43d   :  { %5056 = vmatpush3.bf16.msra.mxu1 %v5872_v63  ;;  %5035 = vmatprep.subr.bf16.mxu0 %v5873_v0 }
 0x43e   :  { %5057 = vmatprep.subr.bf16.mxu1 %v5874_v1 }
 0x440   :  { %5036 = vmatpush3.bf16.msra.mxu0 %v5875_v49 }
 0x441   :  { %5058 = vmatpush3.bf16.msra.mxu1 %v5876_v2  ;;  %5037 = vmatprep.subr.bf16.mxu0 %v5877_v3 }
 0x442   :  { %5059 = vmatprep.subr.bf16.mxu1 %v5878_v8 }
 0x444   :  { %5038 = vmatpush3.bf16.msra.mxu0 %v5879_v4 }
 0x445   :  { %5060 = vmatpush3.bf16.msra.mxu1 %v5880_v5  ;;  %5039 = vmatprep.subr.bf16.mxu0 %v5881_v7 }
 0x446   :  { %5061 = vmatprep.subr.bf16.mxu1 %v5882_v10 }
 0x448   :  { %5040 = vmatpush3.bf16.msra.mxu0 %v5883_v11 }
 0x449   :  { %5062 = vmatpush3.bf16.msra.mxu1 %v5884_v39 }
 0x44b   :  { %4358 = vmatmul.mubr.bf16.vlgmr.msra.gmra.mxu0 %v6282_v30 }
 0x44c   :  { %4398 = vmatmul.mubr.bf16.vlgmr.msra.gmra.mxu1 %v6284_v31 }
 0x46b   :  { %v4113_v14 = vpop.f32.mrf.mxu0  ;;  %v4154_v15 = vpop.f32.mrf.mxu1 }
 0x46c   :  { %v4114_v16 = vadd.f32 %v4113_v14, %v2895_v18 }
 0x46d   :  { %v4115_v17 = vpop.f32.mrf.mxu0  ;;  %v4156_v19 = vpop.f32.mrf.mxu1 }
 0x46e   :  { %v4155_v21 = vadd.f32 %v4154_v15, %v4114_v16  ;;  %v4116_v30 = vadd.f32 %v4115_v17, %v2899_v13 }
 0x46f   :  { %v4117_v26 = vpop.f32.mrf.mxu0  ;;  %v4158_v31 = vpop.f32.mrf.mxu1 }
 0x470   :  { %v4405_v29 = vsub.f32 0.0, %v4155_v21  ;;  %v4157_v24 = vadd.f32 %v4156_v19, %v4116_v30 }
 0x471   :  { %v4118_v25 = vpop.f32.mrf.mxu0  ;;  %v4159_v27 = vpop.f32.mrf.mxu1 }
 0x472   :  { %v4412_v32 = vmul.f32 1.442695, %v4405_v29  ;;  %v4406_v28 = vsub.f32 0.0, %v4157_v24 }
 0x474   :  { %5887 = vpow2.f32 %v4412_v32  ;;  %v4414_v20 = vmul.f32 1.442695, %v4406_v28 }
 0x476   :  { %5889 = vpow2.f32 %v4414_v20 }
 0x481   :  { %v5888_v33 = vpop.eup %5887 }
 0x482   :  { %v4426_v6 = vadd.f32 1.0, %v5888_v33 }
 0x483   :  { %v5890_v34 = vpop.eup %5889 }
 0x484   :  { %5891 = vrcp.f32 %v4426_v6  ;;  %v4427_v35 = vadd.f32 1.0, %v5890_v34 }
 0x486   :  { %5893 = vrcp.f32 %v4427_v35 }
 0x491   :  { %v5892_v36 = vpop.eup %5891 }
 0x492   :  { %4440 = vst [vmem:[#allocation14] sm:$0xff] %v5892_v36 }
 0x493   :  { %v5894_v37 = vpop.eup %5893 }
 0x494   :  { %4441 = vst [vmem:[#allocation14 + $0x8] sm:$0xff] %v5894_v37 }
 0x4ab   :  { %v4195_v41 = vpop.f32.mrf.mxu0  ;;  %v4236_v42 = vpop.f32.mrf.mxu1 }
 0x4ac   :  { %v4196_v43 = vadd.f32 %v4195_v41, %v2903_v52 }
 0x4ad   :  { %v4197_v44 = vpop.f32.mrf.mxu0  ;;  %v4238_v45 = vpop.f32.mrf.mxu1 }
 0x4ae   :  { %v4237_v46 = vadd.f32 %v4236_v42, %v4196_v43  ;;  %v4198_v48 = vadd.f32 %v4197_v44, %v2907_v40 }
 0x4af   :  { %v4199_v50 = vpop.f32.mrf.mxu0  ;;  %v4240_v51 = vpop.f32.mrf.mxu1 }
 0x4b0   :  { %v4407_v53 = vsub.f32 0.0, %v4237_v46  ;;  %v4239_v54 = vadd.f32 %v4238_v45, %v4198_v48 }
 0x4b1   :  { %v4200_v55 = vpop.f32.mrf.mxu0  ;;  %v4241_v56 = vpop.f32.mrf.mxu1 }
 0x4b2   :  { %v4416_v57 = vmul.f32 1.442695, %v4407_v53  ;;  %v4408_v58 = vsub.f32 0.0, %v4239_v54 }
 0x4b4   :  { %5895 = vpow2.f32 %v4416_v57  ;;  %v4418_v38 = vmul.f32 1.442695, %v4408_v58 }
 0x4b6   :  { %5897 = vpow2.f32 %v4418_v38 }
 0x4b7   :  { %6066 = shalt.err (!%p6063_p11)
}
 0x4b8   :  { %4468 = dma.vmem_to_hbm [thread:$0]  %s4466_s16, 256, %s6338_s11, [#allocation16]   ;;  %v2910_v23 = vsub.s32 4, %v6242_v47  ;;  %v2914_v63 = vsub.s32 5, %v6242_v47  ;;  %v2918_v31 = vsub.s32 6, %v6242_v47 }
 0x4b9   :  { %s6122_s11 = smov [#allocation14]  }
 0x4ba   :  { %v2911_v0 = vrot.slane %v6305_v12, %v2910_v23  ;;  %v2915_v1 = vrot.slane %v6305_v12, %v2914_v63  ;;  %v2919_v25 = vrot.slane %v6305_v12, %v2918_v31  ;;  %s4455_s19 = sshll.u32 %s6122_s11, 4  ;;  %s4456_s19 = int_to_ptr.vmem [resolvable:$true] %s4455_s19 }
 0x4bb   :  { %s6075_s20 = scalar_lea.vmem %s4456_s19, 896  ;;  %p6080_p13 = scmp.lt.s32.totalorder %s4456_s19, %s4456_s19 }
 0x4bc   :  { %p6076_p12 = scmp.ne.s32.totalorder %s4456_s19, %s6075_s20  ;;  %p6081_p0 = scmp.lt.s32.totalorder %s6075_s20, %s6075_s20 }
 0x4be   :  { %p6082_p1 = por %p6081_p0, %p6080_p13 }
 0x4c0   :  { %p6083_p2 = pnand %p6082_p1, %p6076_p12 }
 0x4c1   :  { %v5896_v9 = vpop.eup %5895 }
 0x4c2   :  { %v4428_v59 = vadd.f32 1.0, %v5896_v9 }
 0x4c3   :  { %v5898_v60 = vpop.eup %5897 }
 0x4c4   :  { %5899 = vrcp.f32 %v4428_v59  ;;  %v4429_v22 = vadd.f32 1.0, %v5898_v60 }
 0x4c6   :  { %5901 = vrcp.f32 %v4429_v22 }
 0x4d1   :  { %v5900_v61 = vpop.eup %5899 }
 0x4d2   :  { %4442 = vst [vmem:[#allocation14 + $0x10] sm:$0xff] %v5900_v61 }
 0x4d3   :  { %v5902_v62 = vpop.eup %5901 }
 0x4d4   :  { %4443 = vst [vmem:[#allocation14 + $0x18] sm:$0xff] %v5902_v62 }
 0x4eb   :  { %v4277_v49 = vpop.f32.mrf.mxu0 }
 0x4ec   :  { %v4278_v2 = vadd.f32 %v4277_v49, %v2911_v0  ;;  %v4318_v3 = vpop.f32.mrf.mxu1 }
 0x4ed   :  { %v4279_v8 = vpop.f32.mrf.mxu0 }
 0x4ee   :  { %v4319_v4 = vadd.f32 %v4318_v3, %v4278_v2  ;;  %v4280_v5 = vadd.f32 %v4279_v8, %v2915_v1  ;;  %v4320_v7 = vpop.f32.mrf.mxu1 }
 0x4ef   :  { %v4281_v10 = vpop.f32.mrf.mxu0 }
 0x4f0   :  { %v4409_v11 = vsub.f32 0.0, %v4319_v4  ;;  %v4321_v39 = vadd.f32 %v4320_v7, %v4280_v5  ;;  %v4322_v18 = vpop.f32.mrf.mxu1 }
 0x4f1   :  { %v4282_v13 = vpop.f32.mrf.mxu0 }
 0x4f2   :  { %v4420_v14 = vmul.f32 1.442695, %v4409_v11  ;;  %v4410_v15 = vsub.f32 0.0, %v4321_v39  ;;  %v4323_v16 = vpop.f32.mrf.mxu1 }
 0x4f4   :  { %5903 = vpow2.f32 %v4420_v14  ;;  %v4422_v17 = vmul.f32 1.442695, %v4410_v15 }
 0x4f6   :  { %5905 = vpow2.f32 %v4422_v17 }
 0x501   :  { %v5904_v19 = vpop.eup %5903 }
 0x502   :  { %v4430_v21 = vadd.f32 1.0, %v5904_v19 }
 0x503   :  { %v5906_v30 = vpop.eup %5905 }
 0x504   :  { %5907 = vrcp.f32 %v4430_v21  ;;  %v4431_v26 = vadd.f32 1.0, %v5906_v30 }
 0x506   :  { %5909 = vrcp.f32 %v4431_v26 }
 0x50b   :  { %v5041_v29 = vpop.f32.mrf.mxu0 }
 0x50c   :  { %v5063_v24 = vpop.f32.mrf.mxu1 }
 0x50d   :  { %v5042_v27 = vpop.f32.mrf.mxu0 }
 0x50e   :  { %v5043_v32 = vadd.f32 %v5042_v27, %v5041_v29  ;;  %v5064_v28 = vpop.f32.mrf.mxu1 }
 0x50f   :  { %v5044_v20 = vpop.f32.mrf.mxu0  ;;  %v5065_v6 = vadd.f32 %v5064_v28, %v5063_v24 }
 0x510   :  { %v4360_v33 = vadd.f32 %v5043_v32, %v2919_v25  ;;  %v5066_v34 = vpop.f32.mrf.mxu1 }
 0x511   :  { %v5908_v35 = vpop.eup %5907  ;;  %v5045_v36 = vpop.f32.mrf.mxu0 }
 0x512   :  { %4444 = vst [vmem:[#allocation14 + $0x20] sm:$0xff] %v5908_v35  ;;  %v4400_v37 = vadd.f32 %v5065_v6, %v4360_v33  ;;  %v5067_v52 = vpop.f32.mrf.mxu1 }
 0x513   :  { %v5910_v40 = vpop.eup %5909 }
 0x514   :  { %4445 = vst [vmem:[#allocation14 + $0x28] sm:$0xff] %v5910_v40  ;;  %v4411_v41 = vsub.f32 0.0, %v4400_v37 }
 0x516   :  { %v4424_v47 = vmul.f32 1.442695, %v4411_v41 }
 0x518   :  { %5911 = vpow2.f32 %v4424_v47 }
 0x525   :  { %v5912_v42 = vpop.eup %5911 }
 0x526   :  { %v4432_v43 = vadd.f32 1.0, %v5912_v42 }
 0x528   :  { %5913 = vrcp.f32 %v4432_v43 }
 0x535   :  { %v5914_v12 = vpop.eup %5913 }
 0x536   :  { %4446 = vst [vmem:[#allocation14 + $0x30] sm:$0xff] %v5914_v12 }
 0x537   :  { %6086 = shalt.err (!%p6083_p2)
}
 0x538   :  { %4458 = dma.vmem_to_hbm [thread:$0]  %s4456_s19, 896, %s6337_s10, [#allocation4]  }
 0x539   :  { %6103 = dma.done.wait [#allocation4], 896  }
 0x53a   :  { %6104 = vsyncadd [#allocation4], 4294966400 }
 0x53b   :  { %6105 = dma.done.wait [#allocation16], 256  }
 0x53c   :  { %6106 = vsyncadd [#allocation16], 4294967040 }
 0x53d   :  { %4475 = vsyncpa [#allocation3], 1 }
 0x53e   :  { %4476 = vsyncpa [#allocation6], 1 }
 0x53f   :  { %4477 = vsyncpa [#allocation9], 1 }
 0x540   :  { %4478 = vsyncpa [#allocation12], 1 }
 0x541   :  { %4479 = vsyncpa [#allocation4], 1 }
 0x542   :  { %4480 = vsyncpa [#allocation16], 1 }

</bundles_post_ra>
